<compile_context>
chip_gen: v5e
topology: v5e:2x2
jax: 0.10.0
libtpu: 0.0.40
codegen_flags: <defaults>
</compile_context>

<pallas_src>
import jax
import jax.numpy as jnp
from jax.experimental import pallas as pl
from jax.experimental.pallas import tpu as pltpu


def _tile_pool_update(ids_ref, x_ref, w1_ref, b1_ref, pooled_ref):
    """fc_vertex + ReLU on one node tile, then accumulate the per-graph sum."""
    # In-kernel f32 -> bf16 cast of the streamed node tile (VPU, hidden under
    # the MXU); accumulation stays f32 via preferred_element_type.
    h = jnp.dot(x_ref[...].astype(jnp.bfloat16), w1_ref[...],
                preferred_element_type=jnp.float32)
    h = jnp.maximum(h + b1_ref[...], 0.0)

    # global_add_pool: one-hot pooling matrix built in VMEM from this tile's
    # graph ids (bf16 is exact for 0/1).  S[g, j] = 1 iff batch[j] == g;
    # padded nodes (id == num_graphs) contribute nothing.
    num_graphs = pooled_ref.shape[0]
    node_tile = ids_ref.shape[1]
    graph_iota = jax.lax.broadcasted_iota(jnp.int32, (num_graphs, node_tile), 0)
    onehot = (ids_ref[...] == graph_iota).astype(jnp.bfloat16)

    pooled_ref[...] += jnp.dot(onehot, h.astype(jnp.bfloat16),
                               preferred_element_type=jnp.float32)


def node_pool_kernel(ids_ref, x_ref, w1_ref, b1_ref, pooled_ref):
    """Multi-slice path.  Grid = (num_slices ["parallel"], tiles ["arbitrary"]).

    pooled_ref is the resident (B, H_pad) output block for this slice
    (leading slice dim squeezed out via pl.Squeezed()).
    """
    @pl.when(pl.program_id(1) == 0)
    def _init():
        pooled_ref[...] = jnp.zeros_like(pooled_ref)

    _tile_pool_update(ids_ref, x_ref, w1_ref, b1_ref, pooled_ref)


def node_pool_head_kernel(ids_ref, x_ref, w1_ref, b1_ref,
                          w2_ref, b2_ref, w3_ref, b3_ref,
                          out_ref, pooled_ref):
    """Single-slice path.  Grid = (num_tiles ["arbitrary"],).

    Pooled sum lives in a VMEM scratch; the tiny global MLP runs on the last
    grid step and writes the final (B, target) output directly.
    """
    t = pl.program_id(0)

    @pl.when(t == 0)
    def _init():
        pooled_ref[...] = jnp.zeros_like(pooled_ref)
        out_ref[...] = jnp.zeros_like(out_ref)

    _tile_pool_update(ids_ref, x_ref, w1_ref, b1_ref, pooled_ref)

    @pl.when(t == pl.num_programs(0) - 1)
    def _head():
        g = jnp.dot(pooled_ref[...], w2_ref[...],
                    preferred_element_type=jnp.float32)
        g = jnp.maximum(g + b2_ref[...], 0.0)
        out = jnp.dot(g, w3_ref[...], preferred_element_type=jnp.float32)
        out_ref[...] = (out + b3_ref[...]).astype(out_ref.dtype)


def _default_num_slices():
    # v7x has 2 TensorCores/chip worth sharding the node loop across;
    # v5e/v6e are single-TC so a parallel axis would only add overhead.
    try:
        kind = jax.devices()[0].device_kind.lower()
    except Exception:
        return 1
    return 2 if "v7" in kind else 1


def deep_multisets_forward(x, batch, params, num_graphs, *,
                           node_tile=1024, num_slices=None):
    """x: [N, F] float32, batch: [N] int graph ids in [0, num_graphs)."""
    n, fea_dim = x.shape
    w1, b1, w2, b2, w3, b3 = params
    hidden = w1.shape[1]
    target = w3.shape[1]

    if num_slices is None:
        num_slices = _default_num_slices()
    num_slices = max(1, int(num_slices))

    # Lane-pad hidden to a multiple of 128 (lane-dense h / pooled / stores).
    # Padded columns/rows are zero everywhere, so the result is unchanged.
    hidden_pad = ((hidden + 127) // 128) * 128
    hp = hidden_pad - hidden
    w1p = jnp.pad(w1, ((0, 0), (0, hp))).astype(jnp.bfloat16)  # tiny wrapper cast
    b1p = jnp.pad(b1, ((0, 0), (0, hp)))
    w2p = jnp.pad(w2, ((0, hp), (0, hp)))
    b2p = jnp.pad(b2, ((0, 0), (0, hp)))
    w3p = jnp.pad(w3, ((0, hp), (0, 0)))

    # Pad nodes to a multiple of num_slices * node_tile so the parallel axis
    # never collapses (padded nodes get an out-of-range graph id -> zero pool).
    tile_span = node_tile * num_slices
    n_pad = ((n + tile_span - 1) // tile_span) * tile_span
    if n_pad != n:
        x = jnp.pad(x, ((0, n_pad - n), (0, 0)))
        batch = jnp.pad(batch, (0, n_pad - n), constant_values=num_graphs)
    num_tiles = n_pad // node_tile
    tiles_per_slice = num_tiles // num_slices

    ids = batch.astype(jnp.int32).reshape(1, n_pad)

    # Advisory cost + an explicit scoped-VMEM limit (v5e default is only 16 MiB).
    flops = (2 * n_pad * fea_dim * hidden_pad
             + 2 * num_graphs * n_pad * hidden_pad
             + 2 * num_graphs * hidden_pad * hidden_pad
             + 2 * num_graphs * hidden_pad * target)
    bytes_accessed = (n_pad * fea_dim * 4 + n_pad * 4
                      + fea_dim * hidden_pad * 2 + hidden_pad * 4
                      + hidden_pad * hidden_pad * 4 + hidden_pad * target * 4
                      + num_slices * num_graphs * hidden_pad * 4
                      + num_graphs * target * 4)
    cost = pl.CostEstimate(flops=flops, transcendentals=0,
                           bytes_accessed=bytes_accessed)
    vmem_est = (2 * node_tile * fea_dim * 4          # x double-buffer (f32)
                + 2 * node_tile * 4                  # ids double-buffer
                + 2 * fea_dim * hidden_pad * 2       # W1 (bf16)
                + 2 * hidden_pad * 4                 # b1
                + 2 * num_graphs * hidden_pad * 4    # pooled block / scratch
                + 2 * (hidden_pad * hidden_pad + 2 * hidden_pad
                       + hidden_pad * target + target) * 4)  # head weights
    vmem_limit = int(min(48 * 2**20, max(32 * 2**20, 2 * vmem_est)))

    if num_slices == 1:
        # Single resident accumulator; head fused into the last grid step.
        # NOTE: if the x DMA is still exposed for very small fea_dim, the x
        # BlockSpec can additionally take pipeline_mode=pl.Buffered(3).
        out = pl.pallas_call(
            node_pool_head_kernel,
            out_shape=jax.ShapeDtypeStruct((num_graphs, target), jnp.float32),
            grid_spec=pltpu.PrefetchScalarGridSpec(
                num_scalar_prefetch=0,
                grid=(num_tiles,),
                in_specs=[
                    pl.BlockSpec((1, node_tile), lambda t: (0, t)),
                    pl.BlockSpec((node_tile, fea_dim), lambda t: (t, 0)),
                    pl.BlockSpec((fea_dim, hidden_pad), lambda t: (0, 0)),
                    pl.BlockSpec((1, hidden_pad), lambda t: (0, 0)),
                    pl.BlockSpec((hidden_pad, hidden_pad), lambda t: (0, 0)),
                    pl.BlockSpec((1, hidden_pad), lambda t: (0, 0)),
                    pl.BlockSpec((hidden_pad, target), lambda t: (0, 0)),
                    pl.BlockSpec((1, target), lambda t: (0, 0)),
                ],
                out_specs=pl.BlockSpec((num_graphs, target), lambda t: (0, 0)),
                scratch_shapes=[pltpu.VMEM((num_graphs, hidden_pad),
                                           jnp.float32)],
            ),
            compiler_params=pltpu.CompilerParams(
                dimension_semantics=("arbitrary",),
                vmem_limit_bytes=vmem_limit),
            cost_estimate=cost,
        )(ids, x, w1p, b1p, w2p, b2p, w3p, b3)
        return out

    # Multi-slice (v7x) path: per-slice partial pools, summed + tiny head in jnp.
    pooled_parts = pl.pallas_call(
        node_pool_kernel,
        out_shape=jax.ShapeDtypeStruct((num_slices, num_graphs, hidden_pad),
                                       jnp.float32),
        grid_spec=pltpu.PrefetchScalarGridSpec(
            num_scalar_prefetch=0,
            grid=(num_slices, tiles_per_slice),
            in_specs=[
                pl.BlockSpec((1, node_tile),
                             lambda s, t: (0, s * tiles_per_slice + t)),
                pl.BlockSpec((node_tile, fea_dim),
                             lambda s, t: (s * tiles_per_slice + t, 0)),
                pl.BlockSpec((fea_dim, hidden_pad), lambda s, t: (0, 0)),
                pl.BlockSpec((1, hidden_pad), lambda s, t: (0, 0)),
            ],
            out_specs=pl.BlockSpec((pl.Squeezed(), num_graphs, hidden_pad),
                                   lambda s, t: (s, 0, 0)),
        ),
        compiler_params=pltpu.CompilerParams(
            dimension_semantics=("parallel", "arbitrary"),
            vmem_limit_bytes=vmem_limit),
        cost_estimate=cost,
    )(ids, x, w1p, b1p)

    pooled = jnp.sum(pooled_parts, axis=0)
    g = jax.nn.relu(pooled @ w2p + b2p)        # microscopic head: plain XLA
    return g @ w3p + b3


def init_params(key, fea_dim, hidden_units, target_dim):
    """Deterministic PyTorch-style (uniform +/- 1/sqrt(fan_in)) init."""
    def linear(key, fan_in, fan_out):
        kw, kb = jax.random.split(key)
        bound = 1.0 / jnp.sqrt(jnp.float32(fan_in))
        w = jax.random.uniform(kw, (fan_in, fan_out), jnp.float32, -bound, bound)
        b = jax.random.uniform(kb, (1, fan_out), jnp.float32, -bound, bound)
        return w, b

    k1, k2, k3 = jax.random.split(key, 3)
    w1, b1 = linear(k1, fea_dim, hidden_units)
    w2, b2 = linear(k2, hidden_units, hidden_units)
    w3, b3 = linear(k3, hidden_units, target_dim)
    return (w1, b1, w2, b2, w3, b3)


def reference_forward(x, batch, params, num_graphs, *, bf16_like_kernel=True):
    w1, b1, w2, b2, w3, b3 = params
    if bf16_like_kernel:
        h = jnp.dot(x.astype(jnp.bfloat16), w1.astype(jnp.bfloat16),
                    preferred_element_type=jnp.float32)
        h = jax.nn.relu(h + b1)
        # Kernel pools h in bf16 (one-hot exact), accumulating in f32.
        h = h.astype(jnp.bfloat16).astype(jnp.float32)
    else:
        h = jax.nn.relu(x @ w1 + b1)
    pooled = jax.ops.segment_sum(h, batch, num_segments=num_graphs)
    g = jax.nn.relu(pooled @ w2 + b2)
    return g @ w3 + b3


if __name__ == "__main__":
    key = jax.random.PRNGKey(0)
    kx, kp = jax.random.split(key)

    # Small, forward-consistent shapes: N=16 nodes, fea_dim=8, hidden=32,
    # target=4, B=2 graphs (first 8 nodes -> graph 0, rest -> graph 1).
    N, FEA, HIDDEN, TARGET, B = 16, 8, 32, 4, 2
    x = jax.random.normal(kx, (N, FEA), dtype=jnp.float32)
    batch = jnp.concatenate(
        [jnp.zeros((N // 2,), jnp.int32), jnp.ones((N // 2,), jnp.int32)])

    params = init_params(kp, FEA, HIDDEN, TARGET)

    # Default path (fused head on single-TC chips, 2 slices on v7x).
    out = deep_multisets_forward(x, batch, params, num_graphs=B)
    out = jax.block_until_ready(out)
    assert out.shape == (B, TARGET)

    # Also exercise the multi-slice (v7x-style) path explicitly.
    out2 = jax.block_until_ready(
        deep_multisets_forward(x, batch, params, num_graphs=B, num_slices=2))
    assert out2.shape == (B, TARGET)

    # Tight check against a reference that mirrors the kernel's bf16 streaming
    # + bf16 pooling (accumulation in f32).
    ref_bf16 = reference_forward(x, batch, params, num_graphs=B,
                                 bf16_like_kernel=True)
    assert jnp.allclose(out, ref_bf16, atol=2e-3, rtol=2e-3)
    assert jnp.allclose(out2, ref_bf16, atol=2e-3, rtol=2e-3)

    # Loose check against the pure-f32 reference (bf16 streaming error only).
    ref_f32 = reference_forward(x, batch, params, num_graphs=B,
                                bf16_like_kernel=False)
    assert jnp.allclose(out, ref_f32, atol=5e-2, rtol=5e-2)
    assert jnp.allclose(out2, ref_f32, atol=5e-2, rtol=5e-2)

    print("KERNEL_OK")
</pallas_src>

<mosaic_0001>
module attributes {stable_mosaic.version = 11 : i64} {
  func.func @node_pool_head_kernel(%arg0: i32, %arg1: memref<1x1024xi32, #tpu.memory_space<vmem>>, %arg2: memref<1024x8xf32, #tpu.memory_space<vmem>>, %arg3: memref<8x128xbf16, #tpu.memory_space<vmem>>, %arg4: memref<1x128xf32, #tpu.memory_space<vmem>>, %arg5: memref<128x128xf32, #tpu.memory_space<vmem>>, %arg6: memref<1x128xf32, #tpu.memory_space<vmem>>, %arg7: memref<128x4xf32, #tpu.memory_space<vmem>>, %arg8: memref<1x4xf32, #tpu.memory_space<vmem>>, %arg9: memref<2x4xf32, #tpu.memory_space<vmem>>, %arg10: memref<2x128xf32, #tpu.memory_space<vmem>>) attributes {dimension_semantics = [#tpu.dimension_semantics<arbitrary>], iteration_bounds = array<i64: 1>, scalar_prefetch = 0 : i64, scratch_operands = 1 : i64, tpu.core_type = #tpu.core_type<tc>, window_params = [{transform_indices = @transform_0, window_bounds = array<i64: 1, 1024>}, {transform_indices = @transform_1, window_bounds = array<i64: 1024, 8>}, {pipeline_mode = #tpu.pipeline_mode<synchronous>, transform_indices = @transform_2, window_bounds = array<i64: 8, 128>}, {pipeline_mode = #tpu.pipeline_mode<synchronous>, transform_indices = @transform_3, window_bounds = array<i64: 1, 128>}, {pipeline_mode = #tpu.pipeline_mode<synchronous>, transform_indices = @transform_4, window_bounds = array<i64: 128, 128>}, {pipeline_mode = #tpu.pipeline_mode<synchronous>, transform_indices = @transform_5, window_bounds = array<i64: 1, 128>}, {pipeline_mode = #tpu.pipeline_mode<synchronous>, transform_indices = @transform_6, window_bounds = array<i64: 128, 4>}, {pipeline_mode = #tpu.pipeline_mode<synchronous>, transform_indices = @transform_7, window_bounds = array<i64: 1, 4>}, {pipeline_mode = #tpu.pipeline_mode<synchronous>, transform_indices = @transform_8, window_bounds = array<i64: 2, 4>}]} {
    %c0_i32 = arith.constant 0 : i32
    %0 = arith.cmpi eq, %arg0, %c0_i32 : i32
    %1 = arith.extui %0 : i1 to i32
    %c0_i32_0 = arith.constant 0 : i32
    %2 = arith.cmpi ne, %1, %c0_i32_0 : i32
    scf.if %2 {
      %cst_16 = arith.constant 0.000000e+00 : f32
      %27 = vector.broadcast %cst_16 : f32 to vector<2x128xf32>
      %c0_17 = arith.constant 0 : index
      %c0_18 = arith.constant 0 : index
      %28 = vector.load %arg10[%c0_17, %c0_18] : memref<2x128xf32, #tpu.memory_space<vmem>>, vector<2x128xf32>
      tpu.vector_store %arg10[%c0_17, %c0_18], %27 {strides = array<i32>} : memref<2x128xf32, #tpu.memory_space<vmem>>, vector<2x128xf32>,
      %cst_19 = arith.constant 0.000000e+00 : f32
      %29 = vector.broadcast %cst_19 : f32 to vector<2x4xf32>
      %c0_20 = arith.constant 0 : index
      %c0_21 = arith.constant 0 : index
      %30 = vector.load %arg9[%c0_20, %c0_21] : memref<2x4xf32, #tpu.memory_space<vmem>>, vector<2x4xf32>
      tpu.vector_store %arg9[%c0_20, %c0_21], %29 {strides = array<i32>} : memref<2x4xf32, #tpu.memory_space<vmem>>, vector<2x4xf32>,
    } else {
    }
    %c0 = arith.constant 0 : index
    %c0_1 = arith.constant 0 : index
    %3 = vector.load %arg2[%c0, %c0_1] : memref<1024x8xf32, #tpu.memory_space<vmem>>, vector<1024x8xf32>
    %4 = arith.truncf %3 : vector<1024x8xf32> to vector<1024x8xbf16>
    %c0_2 = arith.constant 0 : index
    %c0_3 = arith.constant 0 : index
    %5 = vector.load %arg3[%c0_2, %c0_3] : memref<8x128xbf16, #tpu.memory_space<vmem>>, vector<8x128xbf16>
    %cst = arith.constant dense<0.000000e+00> : vector<1024x128xf32>
    %6 = tpu.matmul %4, %5, %cst {dimension_numbers = #tpu.dot_dimension_numbers<[1], [0], [0], [1], [0, 0, 1, 1], [], []>} : vector<1024x8xbf16>, vector<8x128xbf16>, vector<1024x128xf32> -> vector<1024x128xf32>
    %c0_4 = arith.constant 0 : index
    %c0_5 = arith.constant 0 : index
    %7 = vector.load %arg4[%c0_4, %c0_5] : memref<1x128xf32, #tpu.memory_space<vmem>>, vector<1x128xf32>
    %8 = vector.broadcast %7 : vector<1x128xf32> to vector<1024x128xf32>
    %9 = arith.addf %6, %8 : vector<1024x128xf32>
    %cst_6 = arith.constant 0.000000e+00 : f32
    %10 = vector.broadcast %cst_6 : f32 to vector<1024x128xf32>
    %11 = arith.maximumf %9, %10 : vector<1024x128xf32>
    %12 = tpu.iota {dimensions = array<i32: 0>} : vector<2x1024xi32>
    %c0_7 = arith.constant 0 : index
    %c0_8 = arith.constant 0 : index
    %13 = vector.load %arg1[%c0_7, %c0_8] : memref<1x1024xi32, #tpu.memory_space<vmem>>, vector<1x1024xi32>
    %14 = vector.broadcast %13 : vector<1x1024xi32> to vector<2x1024xi32>
    %15 = arith.cmpi eq, %14, %12 : vector<2x1024xi32>
    %16 = arith.extui %15 : vector<2x1024xi1> to vector<2x1024xi32>
    %17 = arith.sitofp %16 : vector<2x1024xi32> to vector<2x1024xf32>
    %18 = arith.truncf %17 : vector<2x1024xf32> to vector<2x1024xbf16>
    %c0_9 = arith.constant 0 : index
    %c0_10 = arith.constant 0 : index
    %19 = vector.load %arg10[%c0_9, %c0_10] : memref<2x128xf32, #tpu.memory_space<vmem>>, vector<2x128xf32>
    %20 = arith.truncf %11 : vector<1024x128xf32> to vector<1024x128xbf16>
    %cst_11 = arith.constant dense<0.000000e+00> : vector<2x128xf32>
    %21 = tpu.matmul %18, %20, %cst_11 {dimension_numbers = #tpu.dot_dimension_numbers<[1], [0], [0], [1], [0, 0, 1, 1], [], []>} : vector<2x1024xbf16>, vector<1024x128xbf16>, vector<2x128xf32> -> vector<2x128xf32>
    %22 = arith.addf %19, %21 : vector<2x128xf32>
    %c0_12 = arith.constant 0 : index
    %c0_13 = arith.constant 0 : index
    %23 = vector.load %arg10[%c0_12, %c0_13] : memref<2x128xf32, #tpu.memory_space<vmem>>, vector<2x128xf32>
    tpu.vector_store %arg10[%c0_12, %c0_13], %22 {strides = array<i32>} : memref<2x128xf32, #tpu.memory_space<vmem>>, vector<2x128xf32>,
    %c0_i32_14 = arith.constant 0 : i32
    %24 = arith.cmpi eq, %arg0, %c0_i32_14 : i32
    %25 = arith.extui %24 : i1 to i32
    %c0_i32_15 = arith.constant 0 : i32
    %26 = arith.cmpi ne, %25, %c0_i32_15 : i32
    scf.if %26 {
      %c0_16 = arith.constant 0 : index
      %c0_17 = arith.constant 0 : index
      %27 = vector.load %arg10[%c0_16, %c0_17] : memref<2x128xf32, #tpu.memory_space<vmem>>, vector<2x128xf32>
      %c0_18 = arith.constant 0 : index
      %c0_19 = arith.constant 0 : index
      %28 = vector.load %arg5[%c0_18, %c0_19] : memref<128x128xf32, #tpu.memory_space<vmem>>, vector<128x128xf32>
      %cst_20 = arith.constant dense<0.000000e+00> : vector<2x128xf32>
      %29 = tpu.matmul %27, %28, %cst_20 {dimension_numbers = #tpu.dot_dimension_numbers<[1], [0], [0], [1], [0, 0, 1, 1], [], []>} : vector<2x128xf32>, vector<128x128xf32>, vector<2x128xf32> -> vector<2x128xf32>
      %c0_21 = arith.constant 0 : index
      %c0_22 = arith.constant 0 : index
      %30 = vector.load %arg6[%c0_21, %c0_22] : memref<1x128xf32, #tpu.memory_space<vmem>>, vector<1x128xf32>
      %31 = vector.broadcast %30 : vector<1x128xf32> to vector<2x128xf32>
      %32 = arith.addf %29, %31 : vector<2x128xf32>
      %cst_23 = arith.constant 0.000000e+00 : f32
      %33 = vector.broadcast %cst_23 : f32 to vector<2x128xf32>
      %34 = arith.maximumf %32, %33 : vector<2x128xf32>
      %c0_24 = arith.constant 0 : index
      %c0_25 = arith.constant 0 : index
      %35 = vector.load %arg7[%c0_24, %c0_25] : memref<128x4xf32, #tpu.memory_space<vmem>>, vector<128x4xf32>
      %cst_26 = arith.constant dense<0.000000e+00> : vector<2x4xf32>
      %36 = tpu.matmul %34, %35, %cst_26 {dimension_numbers = #tpu.dot_dimension_numbers<[1], [0], [0], [1], [0, 0, 1, 1], [], []>} : vector<2x128xf32>, vector<128x4xf32>, vector<2x4xf32> -> vector<2x4xf32>
      %c0_27 = arith.constant 0 : index
      %c0_28 = arith.constant 0 : index
      %37 = vector.load %arg8[%c0_27, %c0_28] : memref<1x4xf32, #tpu.memory_space<vmem>>, vector<1x4xf32>
      %38 = vector.broadcast %37 : vector<1x4xf32> to vector<2x4xf32>
      %39 = arith.addf %36, %38 : vector<2x4xf32>
      %c0_29 = arith.constant 0 : index
      %c0_30 = arith.constant 0 : index
      %40 = vector.load %arg9[%c0_29, %c0_30] : memref<2x4xf32, #tpu.memory_space<vmem>>, vector<2x4xf32>
      tpu.vector_store %arg9[%c0_29, %c0_30], %39 {strides = array<i32>} : memref<2x4xf32, #tpu.memory_space<vmem>>, vector<2x4xf32>,
    } else {
    }
    return
  }
  func.func @transform_0(%arg0: i32) -> (i32, i32) {
    %c0_i32 = arith.constant 0 : i32
    %c0_i32_0 = arith.constant 0 : i32
    return %c0_i32, %arg0 : i32, i32
  }
  func.func @transform_1(%arg0: i32) -> (i32, i32) {
    %c0_i32 = arith.constant 0 : i32
    %c0_i32_0 = arith.constant 0 : i32
    return %arg0, %c0_i32 : i32, i32
  }
  func.func @transform_2(%arg0: i32) -> (i32, i32) {
    %c0_i32 = arith.constant 0 : i32
    %c0_i32_0 = arith.constant 0 : i32
    %c0_i32_1 = arith.constant 0 : i32
    return %c0_i32, %c0_i32_0 : i32, i32
  }
  func.func @transform_3(%arg0: i32) -> (i32, i32) {
    %c0_i32 = arith.constant 0 : i32
    %c0_i32_0 = arith.constant 0 : i32
    %c0_i32_1 = arith.constant 0 : i32
    return %c0_i32, %c0_i32_0 : i32, i32
  }
  func.func @transform_4(%arg0: i32) -> (i32, i32) {
    %c0_i32 = arith.constant 0 : i32
    %c0_i32_0 = arith.constant 0 : i32
    %c0_i32_1 = arith.constant 0 : i32
    return %c0_i32, %c0_i32_0 : i32, i32
  }
  func.func @transform_5(%arg0: i32) -> (i32, i32) {
    %c0_i32 = arith.constant 0 : i32
    %c0_i32_0 = arith.constant 0 : i32
    %c0_i32_1 = arith.constant 0 : i32
    return %c0_i32, %c0_i32_0 : i32, i32
  }
  func.func @transform_6(%arg0: i32) -> (i32, i32) {
    %c0_i32 = arith.constant 0 : i32
    %c0_i32_0 = arith.constant 0 : i32
    %c0_i32_1 = arith.constant 0 : i32
    return %c0_i32, %c0_i32_0 : i32, i32
  }
  func.func @transform_7(%arg0: i32) -> (i32, i32) {
    %c0_i32 = arith.constant 0 : i32
    %c0_i32_0 = arith.constant 0 : i32
    %c0_i32_1 = arith.constant 0 : i32
    return %c0_i32, %c0_i32_0 : i32, i32
  }
  func.func @transform_8(%arg0: i32) -> (i32, i32) {
    %c0_i32 = arith.constant 0 : i32
    %c0_i32_0 = arith.constant 0 : i32
    %c0_i32_1 = arith.constant 0 : i32
    return %c0_i32, %c0_i32_0 : i32, i32
  }
}

</mosaic_0001>

<bundles_post_ra>
// kernel: tpu_custom_call.1
= control target key start
LH: loop header
LB: loop body
LE: loop exit
PB: predicated region body
PF: predicated region fallthrough
CT: control target
= control target key end

     0   :  { %vm428_vm0 = vcmask 1043456   ;;  %vm235_vm1 = vcmask 64512   ;;  %s2364_s0 = inlined_call_operand.vmem [shape: s32[1,1024], index: 0, kind: input, shape index: {}]   ;;  %s2365_s1 = inlined_call_operand.vmem [shape: f32[1024,8], index: 1, kind: input, shape index: {}]   ;;  %s2366_s2 = inlined_call_operand.vmem [shape: bf16[8,128], index: 2, kind: input, shape index: {}]   ;;  %s2367_s3 = inlined_call_operand.vmem [shape: f32[1,128], index: 3, kind: input, shape index: {}]   ;;  %s2368_s4 = inlined_call_operand.vmem [shape: f32[128,128], index: 4, kind: input, shape index: {}]   ;;  %s2369_s5 = inlined_call_operand.vmem [shape: f32[1,128], index: 5, kind: input, shape index: {}]   ;;  %s2370_s6 = inlined_call_operand.vmem [shape: f32[128,4], index: 6, kind: input, shape index: {}]   ;;  %s2371_s7 = inlined_call_operand.vmem [shape: f32[1,4], index: 7, kind: input, shape index: {}]   ;;  %s2372_s8 = inlined_call_operand.hbm [shape: f32[2,4], index: 8, kind: output, shape index: {}]  }
   0x1   :  { %v230_v0 = vld [vmem:[%s2366_s2] sm:$0xf]  ;;  %v39_v2 = vld [vmem:[%s2365_s1 + $0x8] sm:$0xff]  ;;  %v80_v5 = vld [vmem:[%s2365_s1 + $0x150] sm:$0xff] }
   0x2   :  { %v38_v1 = vld [vmem:[%s2365_s1] sm:$0xff]  ;;  %v430_v3 = vsel %vm428_vm0, %v230_v0, 0  ;;  %v81_v6 = vld [vmem:[%s2365_s1 + $0x158] sm:$0xff] }
   0x3   :  { %v166_v4 = vpack.c.bf16 %v39_v2, %v38_v1  ;;  %439 = vmatpush.bf16.msra.mxu0 %v430_v3  ;;  %1294 = vmatpush.bf16.msra.mxu1 %v430_v3  ;;  %v187_v7 = vpack.c.bf16 %v81_v6, %v80_v5 }
   0x4   :  { %1296 = vmatpush.bf16.msra.mxu3 %v430_v3  ;;  %1295 = vmatpush.bf16.msra.mxu2 %v430_v3 }
   0x6   :  { %1206 = vmatmul.msk.bf16.vlgmr.msra.gmra.mxu0 %vm235_vm1, %v166_v4  ;;  %1227 = vmatmul.msk.bf16.vlgmr.msra.gmra.mxu1 %vm235_vm1, %v187_v7 }
   0x7   :  { %13 = vsyncpa [#allocation4], 0  ;;  %v40_v8 = vld [vmem:[%s2365_s1 + $0x10] sm:$0xff]  ;;  %v41_v9 = vld [vmem:[%s2365_s1 + $0x18] sm:$0xff]  ;;  %s1332_s26 = smov [#allocation3]   ;;  %s1197_s28 = sshll.u32 %s2372_s8, 4  ;;  %s1198_s28 = int_to_ptr.hbm [resolvable:$true] %s1197_s28 }
   0x8   :  { %v82_v10 = vld [vmem:[%s2365_s1 + $0x160] sm:$0xff]  ;;  %v83_v11 = vld [vmem:[%s2365_s1 + $0x168] sm:$0xff]  ;;  %v167_v12 = vpack.c.bf16 %v41_v9, %v40_v8  ;;  %v84_v19 = vld [vmem:[%s2365_s1 + $0x170] sm:$0xff]  ;;  %s1195_s27 = sshll.u32 %s1332_s26, 4  ;;  %s1196_s27 = int_to_ptr.vmem [resolvable:$true] %s1195_s27 }
   0x9   :  { %v188_v13 = vpack.c.bf16 %v83_v11, %v82_v10  ;;  %v134_v14 = vld [vmem:[%s2365_s1 + $0x300] sm:$0xff]  ;;  %v135_v15 = vld [vmem:[%s2365_s1 + $0x308] sm:$0xff]  ;;  %v85_v20 = vld [vmem:[%s2365_s1 + $0x178] sm:$0xff] }
   0xa   :  { %v214_v16 = vpack.c.bf16 %v135_v15, %v134_v14  ;;  %v42_v17 = vld [vmem:[%s2365_s1 + $0x20] sm:$0xff]  ;;  %v43_v18 = vld [vmem:[%s2365_s1 + $0x28] sm:$0xff]  ;;  %v189_v22 = vpack.c.bf16 %v85_v20, %v84_v19  ;;  %v136_v23 = vld [vmem:[%s2365_s1 + $0x310] sm:$0xff] }
   0xb   :  { %v168_v21 = vpack.c.bf16 %v43_v18, %v42_v17  ;;  %v137_v24 = vld [vmem:[%s2365_s1 + $0x318] sm:$0xff]  ;;  %v44_v26 = vld [vmem:[%s2365_s1 + $0x30] sm:$0xff]  ;;  %v86_v28 = vld [vmem:[%s2365_s1 + $0x180] sm:$0xff] }
   0xc   :  { %1254 = vmatmul.msk.bf16.vlgmr.msra.gmra.mxu3 %vm235_vm1, %v214_v16  ;;  %v215_v25 = vpack.c.bf16 %v137_v24, %v136_v23  ;;  %v45_v27 = vld [vmem:[%s2365_s1 + $0x38] sm:$0xff]  ;;  %v87_v29 = vld [vmem:[%s2365_s1 + $0x188] sm:$0xff]  ;;  %v138_v32 = vld [vmem:[%s2365_s1 + $0x320] sm:$0xff] }
   0xd   :  { %v169_v30 = vpack.c.bf16 %v45_v27, %v44_v26  ;;  %v190_v31 = vpack.c.bf16 %v87_v29, %v86_v28  ;;  %v139_v33 = vld [vmem:[%s2365_s1 + $0x328] sm:$0xff]  ;;  %v46_v35 = vld [vmem:[%s2365_s1 + $0x40] sm:$0xff]  ;;  %v88_v37 = vld [vmem:[%s2365_s1 + $0x190] sm:$0xff] }
   0xe   :  { %v216_v34 = vpack.c.bf16 %v139_v33, %v138_v32  ;;  %v47_v36 = vld [vmem:[%s2365_s1 + $0x48] sm:$0xff]  ;;  %v89_v38 = vld [vmem:[%s2365_s1 + $0x198] sm:$0xff]  ;;  %v104_v41 = vld [vmem:[%s2365_s1 + $0x210] sm:$0xff] }
   0xf   :  { %v170_v39 = vpack.c.bf16 %v47_v36, %v46_v35  ;;  %v191_v40 = vpack.c.bf16 %v89_v38, %v88_v37  ;;  %v105_v42 = vld [vmem:[%s2365_s1 + $0x218] sm:$0xff]  ;;  %v140_v44 = vld [vmem:[%s2365_s1 + $0x330] sm:$0xff]  ;;  %v90_v49 = vld [vmem:[%s2365_s1 + $0x1a0] sm:$0xff] }
  0x10   :  { %v199_v43 = vpack.c.bf16 %v105_v42, %v104_v41  ;;  %v141_v45 = vld [vmem:[%s2365_s1 + $0x338] sm:$0xff]  ;;  %v48_v47 = vld [vmem:[%s2365_s1 + $0x50] sm:$0xff]  ;;  %v91_v50 = vld [vmem:[%s2365_s1 + $0x1a8] sm:$0xff] }
  0x11   :  { %v217_v46 = vpack.c.bf16 %v141_v45, %v140_v44  ;;  %v49_v48 = vld [vmem:[%s2365_s1 + $0x58] sm:$0xff]  ;;  %v192_v52 = vpack.c.bf16 %v91_v50, %v90_v49  ;;  %v106_v53 = vld [vmem:[%s2365_s1 + $0x220] sm:$0xff]  ;;  %v107_v54 = vld [vmem:[%s2365_s1 + $0x228] sm:$0xff] }
  0x12   :  { %1239 = vmatmul.msk.bf16.vlgmr.msra.gmra.mxu2 %vm235_vm1, %v199_v43  ;;  %v171_v51 = vpack.c.bf16 %v49_v48, %v48_v47  ;;  %v200_v55 = vpack.c.bf16 %v107_v54, %v106_v53  ;;  %v142_v56 = vld [vmem:[%s2365_s1 + $0x340] sm:$0xff]  ;;  %v143_v57 = vld [vmem:[%s2365_s1 + $0x348] sm:$0xff]  ;;  %v92_v61 = vld [vmem:[%s2365_s1 + $0x1b0] sm:$0xff] }
  0x13   :  { %v218_v58 = vpack.c.bf16 %v143_v57, %v142_v56  ;;  %v50_v59 = vld [vmem:[%s2365_s1 + $0x60] sm:$0xff]  ;;  %v51_v60 = vld [vmem:[%s2365_s1 + $0x68] sm:$0xff]  ;;  %v93_v62 = vld [vmem:[%s2365_s1 + $0x1b8] sm:$0xff] }
  0x14   :  { %v172_v63 = vpack.c.bf16 %v51_v60, %v50_v59  ;;  %v193_v0 = vpack.c.bf16 %v93_v62, %v92_v61  ;;  %v108_v1 = vld [vmem:[%s2365_s1 + $0x230] sm:$0xff]  ;;  %v109_v2 = vld [vmem:[%s2365_s1 + $0x238] sm:$0xff]  ;;  %v94_v9 = vld [vmem:[%s2365_s1 + $0x1c0] sm:$0xff] }
  0x15   :  { %v201_v3 = vpack.c.bf16 %v109_v2, %v108_v1  ;;  %v144_v4 = vld [vmem:[%s2365_s1 + $0x350] sm:$0xff]  ;;  %v145_v5 = vld [vmem:[%s2365_s1 + $0x358] sm:$0xff]  ;;  %v95_v10 = vld [vmem:[%s2365_s1 + $0x1c8] sm:$0xff] }
  0x16   :  { %1207 = vmatmul.msk.bf16.gmra.mxu0 %vm235_vm1, %v167_v12  ;;  %1228 = vmatmul.msk.bf16.gmra.mxu1 %vm235_vm1, %v188_v13  ;;  %v219_v6 = vpack.c.bf16 %v145_v5, %v144_v4  ;;  %v52_v7 = vld [vmem:[%s2365_s1 + $0x70] sm:$0xff]  ;;  %v53_v8 = vld [vmem:[%s2365_s1 + $0x78] sm:$0xff]  ;;  %v194_v12 = vpack.c.bf16 %v95_v10, %v94_v9  ;;  %v110_v13 = vld [vmem:[%s2365_s1 + $0x240] sm:$0xff] }
  0x17   :  { %v173_v11 = vpack.c.bf16 %v53_v8, %v52_v7  ;;  %v111_v14 = vld [vmem:[%s2365_s1 + $0x248] sm:$0xff]  ;;  %v146_v16 = vld [vmem:[%s2365_s1 + $0x360] sm:$0xff]  ;;  %v112_v28 = vld [vmem:[%s2365_s1 + $0x250] sm:$0xff] }
  0x18   :  { %v202_v15 = vpack.c.bf16 %v111_v14, %v110_v13  ;;  %v147_v17 = vld [vmem:[%s2365_s1 + $0x368] sm:$0xff]  ;;  %v54_v19 = vld [vmem:[%s2365_s1 + $0x80] sm:$0xff]  ;;  %v113_v29 = vld [vmem:[%s2365_s1 + $0x258] sm:$0xff] }
  0x19   :  { %v220_v18 = vpack.c.bf16 %v147_v17, %v146_v16  ;;  %v55_v20 = vld [vmem:[%s2365_s1 + $0x88] sm:$0xff]  ;;  %v1587_v27 = vld [vmem:[%s2367_s3] ss:$0 sm:$0xff]  ;;  %v149_v32 = vld [vmem:[%s2365_s1 + $0x378] sm:$0xff] }
  0x1a   :  { %v174_v23 = vpack.c.bf16 %v55_v20, %v54_v19  ;;  %v57_v41 = vld [vmem:[%s2365_s1 + $0x98] sm:$0xff]  ;;  %v98_v42 = vld [vmem:[%s2365_s1 + $0x1e0] sm:$0xff]  ;;  %v99_v43 = vld [vmem:[%s2365_s1 + $0x1e8] sm:$0xff] }
  0x1b   :  { %v114_v49 = vld [vmem:[%s2365_s1 + $0x260] sm:$0xff]  ;;  %v115_v50 = vld [vmem:[%s2365_s1 + $0x268] sm:$0xff]  ;;  %v101_v1 = vld [vmem:[%s2365_s1 + $0x1f8] sm:$0xff] }
  0x1c   :  { %1255 = vmatmul.msk.bf16.gmra.mxu3 %vm235_vm1, %v215_v25  ;;  %v151_v53 = vld [vmem:[%s2365_s1 + $0x388] sm:$0xff]  ;;  %v58_v62 = vld [vmem:[%s2365_s1 + $0xa0] sm:$0xff]  ;;  %v116_v8 = vld [vmem:[%s2365_s1 + $0x270] sm:$0xff] }
  0x1d   :  { %v117_v9 = vld [vmem:[%s2365_s1 + $0x278] sm:$0xff] }
  0x1e   :  { %v205_v10 = vpack.c.bf16 %v117_v9, %v116_v8 }
  0x22   :  { %1240 = vmatmul.msk.bf16.gmra.mxu2 %vm235_vm1, %v200_v55 }
  0x26   :  { %1208 = vmatmul.msk.bf16.gmra.mxu0 %vm235_vm1, %v168_v21  ;;  %1229 = vmatmul.msk.bf16.gmra.mxu1 %vm235_vm1, %v189_v22  ;;  %v96_v21 = vld [vmem:[%s2365_s1 + $0x1d0] sm:$0xff]  ;;  %v97_v22 = vld [vmem:[%s2365_s1 + $0x1d8] sm:$0xff] }
  0x27   :  { %v195_v24 = vpack.c.bf16 %v97_v22, %v96_v21  ;;  %v60_v21 = vld [vmem:[%s2365_s1 + $0xb0] sm:$0xff]  ;;  %v61_v22 = vld [vmem:[%s2365_s1 + $0xb8] sm:$0xff] }
  0x2c   :  { %1256 = vmatmul.msk.bf16.gmra.mxu3 %vm235_vm1, %v216_v34 }
  0x32   :  { %1241 = vmatmul.msk.bf16.gmra.mxu2 %vm235_vm1, %v201_v3 }
  0x36   :  { %1209 = vmatmul.msk.bf16.gmra.mxu0 %vm235_vm1, %v169_v30  ;;  %1230 = vmatmul.msk.bf16.gmra.mxu1 %vm235_vm1, %v190_v31  ;;  %v203_v30 = vpack.c.bf16 %v113_v29, %v112_v28  ;;  %v148_v31 = vld [vmem:[%s2365_s1 + $0x370] sm:$0xff] }
  0x37   :  { %v221_v33 = vpack.c.bf16 %v149_v32, %v148_v31  ;;  %v119_v31 = vld [vmem:[%s2365_s1 + $0x288] sm:$0xff] }
  0x3c   :  { %1257 = vmatmul.msk.bf16.gmra.mxu3 %vm235_vm1, %v217_v46  ;;  %v196_v46 = vpack.c.bf16 %v99_v43, %v98_v42 }
  0x42   :  { %1242 = vmatmul.msk.bf16.gmra.mxu2 %vm235_vm1, %v202_v15 }
  0x46   :  { %1210 = vmatmul.msk.bf16.gmra.mxu0 %vm235_vm1, %v170_v39  ;;  %1231 = vmatmul.msk.bf16.gmra.mxu1 %vm235_vm1, %v191_v40  ;;  %v56_v40 = vld [vmem:[%s2365_s1 + $0x90] sm:$0xff] }
  0x47   :  { %v175_v45 = vpack.c.bf16 %v57_v41, %v56_v40 }
  0x4c   :  { %1258 = vmatmul.msk.bf16.gmra.mxu3 %vm235_vm1, %v218_v58 }
  0x52   :  { %1243 = vmatmul.msk.bf16.gmra.mxu2 %vm235_vm1, %v203_v30  ;;  %v118_v30 = vld [vmem:[%s2365_s1 + $0x280] sm:$0xff] }
  0x53   :  { %v206_v32 = vpack.c.bf16 %v119_v31, %v118_v30  ;;  %v122_v30 = vld [vmem:[%s2365_s1 + $0x2a0] sm:$0xff]  ;;  %v123_v31 = vld [vmem:[%s2365_s1 + $0x2a8] sm:$0xff] }
  0x56   :  { %1211 = vmatmul.msk.bf16.gmra.mxu0 %vm235_vm1, %v171_v51  ;;  %1232 = vmatmul.msk.bf16.gmra.mxu1 %vm235_vm1, %v192_v52  ;;  %v204_v51 = vpack.c.bf16 %v115_v50, %v114_v49  ;;  %v150_v52 = vld [vmem:[%s2365_s1 + $0x380] sm:$0xff] }
  0x57   :  { %v222_v54 = vpack.c.bf16 %v151_v53, %v150_v52 }
  0x5c   :  { %1259 = vmatmul.msk.bf16.gmra.mxu3 %vm235_vm1, %v219_v6 }
  0x62   :  { %1244 = vmatmul.msk.bf16.gmra.mxu2 %vm235_vm1, %v204_v51 }
  0x66   :  { %1212 = vmatmul.msk.bf16.gmra.mxu0 %vm235_vm1, %v172_v63  ;;  %1233 = vmatmul.msk.bf16.gmra.mxu1 %vm235_vm1, %v193_v0  ;;  %v59_v63 = vld [vmem:[%s2365_s1 + $0xa8] sm:$0xff]  ;;  %v100_v0 = vld [vmem:[%s2365_s1 + $0x1f0] sm:$0xff] }
  0x67   :  { %v176_v3 = vpack.c.bf16 %v59_v63, %v58_v62  ;;  %v197_v4 = vpack.c.bf16 %v101_v1, %v100_v0 }
  0x6c   :  { %1260 = vmatmul.msk.bf16.gmra.mxu3 %vm235_vm1, %v220_v18 }
  0x72   :  { %1245 = vmatmul.msk.bf16.gmra.mxu2 %vm235_vm1, %v205_v10 }
  0x76   :  { %1213 = vmatmul.msk.bf16.gmra.mxu0 %vm235_vm1, %v173_v11  ;;  %1234 = vmatmul.msk.bf16.gmra.mxu1 %vm235_vm1, %v194_v12  ;;  %v152_v11 = vld [vmem:[%s2365_s1 + $0x390] sm:$0xff]  ;;  %v153_v12 = vld [vmem:[%s2365_s1 + $0x398] sm:$0xff] }
  0x77   :  { %v223_v13 = vpack.c.bf16 %v153_v12, %v152_v11  ;;  %v64_v11 = vld [vmem:[%s2365_s1 + $0xd0] sm:$0xff]  ;;  %v65_v12 = vld [vmem:[%s2365_s1 + $0xd8] sm:$0xff] }
  0x7c   :  { %1261 = vmatmul.msk.bf16.gmra.mxu3 %vm235_vm1, %v221_v33  ;;  %v154_v33 = vld [vmem:[%s2365_s1 + $0x3a0] sm:$0xff] }
  0x82   :  { %1246 = vmatmul.msk.bf16.gmra.mxu2 %vm235_vm1, %v206_v32 }
  0x83   :  { %v441_v25 = vpop.f32.mrf.mxu0  ;;  %v1582_v26 = vpop.f32.mrf.mxu1 }
  0x84   :  { %v442_v34 = vadd.f32 %v1587_v27, %v441_v25 }
  0x86   :  { %1214 = vmatmul.msk.bf16.gmra.mxu0 %vm235_vm1, %v174_v23  ;;  %1235 = vmatmul.msk.bf16.gmra.mxu1 %vm235_vm1, %v195_v24  ;;  %v761_v38 = vmax.f32 %v442_v34, 0.0  ;;  %v177_v24 = vpack.c.bf16 %v61_v22, %v60_v21  ;;  %v155_v34 = vld [vmem:[%s2365_s1 + $0x3a8] sm:$0xff] }
  0x8b   :  { %v443_v35 = vpop.f32.mrf.mxu0  ;;  %v1606_v36 = vpop.f32.mrf.mxu1 }
  0x8c   :  { %v444_v37 = vadd.f32 %v1587_v27, %v443_v35  ;;  %1262 = vmatmul.msk.bf16.gmra.mxu3 %vm235_vm1, %v222_v54  ;;  %v224_v35 = vpack.c.bf16 %v155_v34, %v154_v33  ;;  %v208_v33 = vpack.c.bf16 %v123_v31, %v122_v30  ;;  %v158_v34 = vld [vmem:[%s2365_s1 + $0x3c0] sm:$0xff] }
  0x8e   :  { %v762_v39 = vmax.f32 %v444_v37, 0.0 }
  0x8f   :  { %v681_v59 = vpop.f32.mrf.mxu3 }
  0x90   :  { %v1621_v44 = vpack.c.bf16 %v762_v39, %v761_v38  ;;  %v682_v52 = vadd.f32 %v1587_v27, %v681_v59  ;;  %v157_v59 = vld [vmem:[%s2365_s1 + $0x3b8] sm:$0xff] }
  0x92   :  { %v857_v63 = vmax.f32 %v682_v52, 0.0 }
  0x93   :  { %v446_v47 = vpop.f32.mrf.mxu0  ;;  %v1623_v48 = vpop.f32.mrf.mxu1 }
  0x94   :  { %v447_v55 = vadd.f32 %v1587_v27, %v446_v47 }
  0x96   :  { %1215 = vmatmul.msk.bf16.gmra.mxu0 %vm235_vm1, %v175_v45  ;;  %1236 = vmatmul.msk.bf16.gmra.mxu1 %vm235_vm1, %v196_v46  ;;  %v763_v60 = vmax.f32 %v447_v55, 0.0  ;;  %v62_v45 = vld [vmem:[%s2365_s1 + $0xc0] sm:$0xff]  ;;  %v63_v46 = vld [vmem:[%s2365_s1 + $0xc8] sm:$0xff]  ;;  %v120_v55 = vld [vmem:[%s2365_s1 + $0x290] sm:$0xff] }
  0x97   :  { %v683_v7 = vpop.f32.mrf.mxu3  ;;  %v178_v49 = vpack.c.bf16 %v63_v46, %v62_v45 }
  0x98   :  { %v684_v54 = vadd.f32 %v1587_v27, %v683_v7  ;;  %v606_v7 = vpop.f32.mrf.mxu2 }
  0x99   :  { %v607_v21 = vadd.f32 %v1587_v27, %v606_v7 }
  0x9a   :  { %v858_v0 = vmax.f32 %v684_v54, 0.0 }
  0x9b   :  { %v448_v56 = vpop.f32.mrf.mxu0  ;;  %v1642_v57 = vpop.f32.mrf.mxu1  ;;  %v827_v32 = vmax.f32 %v607_v21, 0.0 }
  0x9c   :  { %v449_v58 = vadd.f32 %v1587_v27, %v448_v56  ;;  %1263 = vmatmul.msk.bf16.gmra.mxu3 %vm235_vm1, %v223_v13  ;;  %v121_v56 = vld [vmem:[%s2365_s1 + $0x298] sm:$0xff]  ;;  %v1747_v9 = vpack.c.bf16 %v858_v0, %v857_v63 }
  0x9e   :  { %v764_v61 = vmax.f32 %v449_v58, 0.0  ;;  %v207_v58 = vpack.c.bf16 %v121_v56, %v120_v55  ;;  %v66_v56 = vld [vmem:[%s2365_s1 + $0xe0] sm:$0xff] }
  0x9f   :  { %v686_v18 = vpop.f32.mrf.mxu3 }
  0xa0   :  { %v1657_v2 = vpack.c.bf16 %v764_v61, %v763_v60  ;;  %v156_v60 = vld [vmem:[%s2365_s1 + $0x3b0] sm:$0xff]  ;;  %1247 = vmatmul.msk.bf16.gmra.mxu2 %vm235_vm1, %v207_v58  ;;  %v67_v58 = vld [vmem:[%s2365_s1 + $0xe8] sm:$0xff] }
  0xa1   :  { %v225_v62 = vpack.c.bf16 %v157_v59, %v156_v60  ;;  %v180_v59 = vpack.c.bf16 %v67_v58, %v66_v56 }
  0xa3   :  { %v451_v5 = vpop.f32.mrf.mxu0  ;;  %v1659_v6 = vpop.f32.mrf.mxu1 }
  0xa4   :  { %v452_v14 = vadd.f32 %v1587_v27, %v451_v5 }
  0xa6   :  { %1216 = vmatmul.msk.bf16.gmra.mxu0 %vm235_vm1, %v176_v3  ;;  %1237 = vmatmul.msk.bf16.gmra.mxu1 %vm235_vm1, %v197_v4  ;;  %v765_v19 = vmax.f32 %v452_v14, 0.0  ;;  %v179_v14 = vpack.c.bf16 %v65_v12, %v64_v11  ;;  %v125_v11 = vld [vmem:[%s2365_s1 + $0x2b8] sm:$0xff] }
  0xa7   :  { %v688_v29 = vpop.f32.mrf.mxu3 }
  0xab   :  { %v453_v15 = vpop.f32.mrf.mxu0  ;;  %v1678_v16 = vpop.f32.mrf.mxu1 }
  0xac   :  { %v454_v17 = vadd.f32 %v1587_v27, %v453_v15  ;;  %1264 = vmatmul.msk.bf16.gmra.mxu3 %vm235_vm1, %v224_v35  ;;  %v159_v35 = vld [vmem:[%s2365_s1 + $0x3c8] sm:$0xff] }
  0xae   :  { %v766_v20 = vmax.f32 %v454_v17, 0.0 }
  0xaf   :  { %v1710_v41 = vpop.f32.mrf.mxu3 }
  0xb0   :  { %v1687_v23 = vpack.c.bf16 %v766_v20, %v765_v19  ;;  %v608_v19 = vpop.f32.mrf.mxu2  ;;  %v687_v20 = vadd.f32 %v1587_v27, %v686_v18  ;;  %1248 = vmatmul.msk.bf16.gmra.mxu2 %vm235_vm1, %v208_v33  ;;  %v692_v0 = vadd.f32 %v1587_v27, %v1710_v41 }
  0xb1   :  { %v609_v22 = vadd.f32 %v1587_v27, %v608_v19  ;;  %v161_v19 = vld [vmem:[%s2365_s1 + $0x3d8] sm:$0xff] }
  0xb2   :  { %v861_v21 = vmax.f32 %v692_v0, 0.0 }
  0xb3   :  { %v456_v25 = vpop.f32.mrf.mxu0  ;;  %v1689_v28 = vpop.f32.mrf.mxu1  ;;  %v828_v18 = vmax.f32 %v609_v22, 0.0 }
  0xb4   :  { %v457_v37 = vadd.f32 %v1587_v27, %v456_v25  ;;  %v689_v25 = vadd.f32 %v1587_v27, %v688_v29 }
  0xb6   :  { %1217 = vmatmul.msk.bf16.gmra.mxu0 %vm235_vm1, %v177_v24  ;;  %v767_v42 = vmax.f32 %v457_v37, 0.0  ;;  %v226_v37 = vpack.c.bf16 %v159_v35, %v158_v34 }
  0xb7   :  { %v1723_v53 = vpop.f32.mrf.mxu3 }
  0xb8   :  { %v694_v7 = vadd.f32 %v1587_v27, %v1723_v53 }
  0xba   :  { %v862_v22 = vmax.f32 %v694_v7, 0.0 }
  0xbb   :  { %v458_v38 = vpop.f32.mrf.mxu0  ;;  %v1707_v39 = vpop.f32.mrf.mxu1 }
  0xbc   :  { %v459_v40 = vadd.f32 %v1587_v27, %v458_v38  ;;  %1265 = vmatmul.msk.bf16.gmra.mxu3 %vm235_vm1, %v225_v62  ;;  %v859_v38 = vmax.f32 %v687_v20, 0.0  ;;  %v1829_v35 = vpack.c.bf16 %v862_v22, %v861_v21  ;;  %v549_v21 = vadd.f32 %v1587_v27, %v1606_v36 }
  0xbe   :  { %v768_v43 = vmax.f32 %v459_v40, 0.0  ;;  %v860_v40 = vmax.f32 %v689_v25, 0.0 }
  0xbf   :  { %v1745_v8 = vpop.f32.mrf.mxu3 }
  0xc0   :  { %v1718_v47 = vpack.c.bf16 %v768_v43, %v767_v42  ;;  %v1780_v42 = vpack.c.bf16 %v828_v18, %v827_v32  ;;  %v1788_v54 = vpack.c.bf16 %v860_v40, %v859_v38  ;;  %v69_v38 = vld [vmem:[%s2365_s1 + $0xf8] sm:$0xff]  ;;  %v697_v58 = vadd.f32 %v1587_v27, %v1745_v8 }
  0xc1   :  { %v552_v8 = vadd.f32 %v1587_v27, %v1623_v48 }
  0xc3   :  { %v1720_v50 = vpop.f32.mrf.mxu0  ;;  %v566_v51 = vpop.f32.mrf.mxu1 }
  0xc4   :  { %v567_v61 = vadd.f32 %v1587_v27, %v566_v51  ;;  %v611_v51 = vpop.f32.mrf.mxu2 }
  0xc6   :  { %1218 = vmatmul.msk.bf16.gmra.mxu0 %vm235_vm1, %v178_v49  ;;  %v811_v4 = vmax.f32 %v567_v61, 0.0 }
  0xc7   :  { %v1762_v24 = vpop.f32.mrf.mxu3 }
  0xc8   :  { %v699_v0 = vadd.f32 %v1587_v27, %v1762_v24  ;;  %v163_v24 = vld [vmem:[%s2365_s1 + $0x3e8] sm:$0xff] }
  0xcb   :  { %v1742_v1 = vpop.f32.mrf.mxu0  ;;  %v568_v3 = vpop.f32.mrf.mxu1 }
  0xcc   :  { %v569_v5 = vadd.f32 %v1587_v27, %v568_v3  ;;  %1266 = vmatmul.msk.bf16.gmra.mxu3 %vm235_vm1, %v226_v37  ;;  %v613_v63 = vpop.f32.mrf.mxu2  ;;  %v612_v3 = vadd.f32 %v1587_v27, %v611_v51  ;;  %v68_v37 = vld [vmem:[%s2365_s1 + $0xf0] sm:$0xff]  ;;  %v557_v51 = vadd.f32 %v1587_v27, %v1659_v6  ;;  %v126_v6 = vld [vmem:[%s2365_s1 + $0x2c0] sm:$0xff] }
  0xce   :  { %v812_v10 = vmax.f32 %v569_v5, 0.0  ;;  %v829_v41 = vmax.f32 %v612_v3, 0.0 }
  0xcf   :  { %v1786_v52 = vpop.f32.mrf.mxu3 }
  0xd0   :  { %v1755_v13 = vpack.c.bf16 %v812_v10, %v811_v4  ;;  %v614_v4 = vadd.f32 %v1587_v27, %v613_v63  ;;  %v124_v10 = vld [vmem:[%s2365_s1 + $0x2b0] sm:$0xff] }
  0xd2   :  { %v830_v12 = vmax.f32 %v614_v4, 0.0 }
  0xd3   :  { %v1757_v15 = vpop.f32.mrf.mxu0  ;;  %v571_v17 = vpop.f32.mrf.mxu1 }
  0xd4   :  { %v572_v29 = vadd.f32 %v1587_v27, %v571_v17  ;;  %v160_v17 = vld [vmem:[%s2365_s1 + $0x3d0] sm:$0xff]  ;;  %v1823_v25 = vpack.c.bf16 %v830_v12, %v829_v41  ;;  %v616_v33 = vpop.f32.mrf.mxu2  ;;  %v807_v41 = vmax.f32 %v557_v51, 0.0 }
  0xd5   :  { %v227_v20 = vpack.c.bf16 %v161_v19, %v160_v17  ;;  %v863_v17 = vmax.f32 %v697_v58, 0.0  ;;  %v864_v19 = vmax.f32 %v699_v0, 0.0 }
  0xd6   :  { %1219 = vmatmul.msk.bf16.gmra.mxu0 %vm235_vm1, %v179_v14  ;;  %v813_v46 = vmax.f32 %v572_v29, 0.0  ;;  %v209_v14 = vpack.c.bf16 %v125_v11, %v124_v10  ;;  %v162_v10 = vld [vmem:[%s2365_s1 + $0x3e0] sm:$0xff]  ;;  %v554_v11 = vadd.f32 %v1587_v27, %v1642_v57  ;;  %v805_v57 = vmax.f32 %v552_v8, 0.0 }
  0xd7   :  { %v1804_v5 = vpop.f32.mrf.mxu3 }
  0xd8   :  { %1249 = vmatmul.msk.bf16.gmra.mxu2 %vm235_vm1, %v209_v14  ;;  %v228_v14 = vpack.c.bf16 %v163_v24, %v162_v10 }
  0xdb   :  { %v1783_v43 = vpop.f32.mrf.mxu0  ;;  %v573_v45 = vpop.f32.mrf.mxu1 }
  0xdc   :  { %v574_v49 = vadd.f32 %v1587_v27, %v573_v45  ;;  %1267 = vmatmul.msk.bf16.gmra.mxu3 %vm235_vm1, %v227_v20  ;;  %v181_v45 = vpack.c.bf16 %v69_v38, %v68_v37  ;;  %v618_v56 = vpop.f32.mrf.mxu2  ;;  %v547_v20 = vadd.f32 %v1587_v27, %v1582_v26  ;;  %v469_v58 = vadd.f32 %v1587_v27, %v1783_v43 }
  0xde   :  { %v814_v55 = vmax.f32 %v574_v49, 0.0  ;;  %v803_v51 = vmax.f32 %v547_v20, 0.0 }
  0xdf   :  { %v1827_v34 = vpop.f32.mrf.mxu3 }
  0xe0   :  { %v1796_v60 = vpack.c.bf16 %v814_v55, %v813_v46  ;;  %v559_v55 = vadd.f32 %v1587_v27, %v1678_v16  ;;  %v127_v16 = vld [vmem:[%s2365_s1 + $0x2c8] sm:$0xff] }
  0xe1   :  { %v210_v7 = vpack.c.bf16 %v127_v16, %v126_v6 }
  0xe2   :  { %v808_v12 = vmax.f32 %v559_v55, 0.0  ;;  %v804_v55 = vmax.f32 %v549_v21, 0.0 }
  0xe3   :  { %v1798_v61 = vpop.f32.mrf.mxu0  ;;  %v576_v62 = vpop.f32.mrf.mxu1 }
  0xe4   :  { %v577_v53 = vadd.f32 %v1587_v27, %v576_v62  ;;  %v619_v62 = vadd.f32 %v1587_v27, %v618_v56  ;;  %v956_v37 = vpack.c.bf16 %v808_v12, %v807_v41  ;;  %v472_v26 = vadd.f32 %v1587_v27, %v1798_v61  ;;  %v71_v56 = vld [vmem:[%s2365_s1 + $0x108] sm:$0xff]  ;;  %v128_v12 = vld [vmem:[%s2365_s1 + $0x2d0] sm:$0xff] }
  0xe5   :  { %v467_v61 = vadd.f32 %v1587_v27, %v1757_v15  ;;  %v954_v43 = vpack.c.bf16 %v804_v55, %v803_v51  ;;  %v462_v15 = vadd.f32 %v1587_v27, %v1720_v50  ;;  %v165_v50 = vld [vmem:[%s2365_s1 + $0x3f8] sm:$0xff] }
  0xe6   :  { %1220 = vmatmul.msk.bf16.gmra.mxu0 %vm235_vm1, %v180_v59  ;;  %v815_v32 = vmax.f32 %v577_v53, 0.0  ;;  %v617_v59 = vadd.f32 %v1587_v27, %v616_v33  ;;  %v832_v4 = vmax.f32 %v619_v62, 0.0  ;;  %1023 = vmatpush.bf16.msrb.mxu3 %v956_v37  ;;  %v773_v6 = vmax.f32 %v472_v26, 0.0  ;;  %v102_v26 = vld [vmem:[%s2365_s1 + $0x200] sm:$0xff] }
  0xe7   :  { %v1849_v63 = vpop.f32.mrf.mxu3  ;;  %v771_v41 = vmax.f32 %v467_v61, 0.0  ;;  %v769_v21 = vmax.f32 %v462_v15, 0.0 }
  0xe8   :  { %v831_v3 = vmax.f32 %v617_v59, 0.0  ;;  %1250 = vmatmul.msk.bf16.gmra.mxu2 %vm235_vm1, %v210_v7  ;;  %v772_v7 = vmax.f32 %v469_v58, 0.0  ;;  %v73_v58 = vld [vmem:[%s2365_s1 + $0x118] sm:$0xff] }
  0xea   :  { %v1871_v48 = vpack.c.bf16 %v832_v4, %v831_v3  ;;  %v464_v4 = vadd.f32 %v1587_v27, %v1742_v1  ;;  %v129_v1 = vld [vmem:[%s2365_s1 + $0x2d8] sm:$0xff] }
  0xeb   :  { %v473_v30 = vpop.f32.mrf.mxu0  ;;  %v578_v31 = vpop.f32.mrf.mxu1 }
  0xec   :  { %v579_v18 = vadd.f32 %v1587_v27, %v578_v31  ;;  %1268 = vmatmul.msk.bf16.gmra.mxu3 %vm235_vm1, %v228_v14  ;;  %v211_v14 = vpack.c.bf16 %v129_v1, %v128_v12 }
  0xee   :  { %v816_v29 = vmax.f32 %v579_v18, 0.0  ;;  %v474_v18 = vadd.f32 %v1587_v27, %v473_v30  ;;  %v70_v30 = vld [vmem:[%s2365_s1 + $0x100] sm:$0xff] }
  0xef   :  { %v1885_v38 = vpop.f32.mrf.mxu3  ;;  %v182_v16 = vpack.c.bf16 %v71_v56, %v70_v30  ;;  %v72_v56 = vld [vmem:[%s2365_s1 + $0x110] sm:$0xff] }
  0xf0   :  { %v1837_v40 = vpack.c.bf16 %v816_v29, %v815_v32  ;;  %v806_v32 = vmax.f32 %v554_v11, 0.0  ;;  %v1883_v29 = vpop.f32.mrf.mxu2  ;;  %v774_v59 = vmax.f32 %v474_v18, 0.0 }
  0xf2   :  { %v955_v0 = vpack.c.bf16 %v806_v32, %v805_v57  ;;  %v939_v10 = vpack.c.bf16 %v774_v59, %v773_v6 }
  0xf3   :  { %v476_v46 = vpop.f32.mrf.mxu0  ;;  %v1839_v49 = vpop.f32.mrf.mxu1 }
  0xf4   :  { %v477_v53 = vadd.f32 %v1587_v27, %v476_v46  ;;  %1024 = vmatpush.bf16.msrb.mxu3 %v955_v0 }
  0xf6   :  { %1221 = vmatmul.msk.bf16.gmra.mxu0 %vm235_vm1, %v181_v45  ;;  %v1887_v45 = vpack.c.bf16 %v864_v19, %v863_v17  ;;  %v775_v36 = vmax.f32 %v477_v53, 0.0  ;;  %v164_v17 = vld [vmem:[%s2365_s1 + $0x3f0] sm:$0xff]  ;;  %v770_v19 = vmax.f32 %v464_v4, 0.0  ;;  %v938_v53 = vpack.c.bf16 %v772_v7, %v771_v41  ;;  %v131_v4 = vld [vmem:[%s2365_s1 + $0x2e8] sm:$0xff] }
  0xf7   :  { %v1907_v11 = vpop.f32.mrf.mxu3  ;;  %v229_v20 = vpack.c.bf16 %v165_v50, %v164_v17 }
  0xf8   :  { %v1905_v24 = vpop.f32.mrf.mxu2  ;;  %1025 = vmatpush.bf16.msrb.mxu3 %v954_v43  ;;  %1251 = vmatmul.msk.bf16.gmra.mxu2 %vm235_vm1, %v211_v14  ;;  %v74_v14 = vld [vmem:[%s2365_s1 + $0x120] sm:$0xff] }
  0xfb   :  { %v478_v22 = vpop.f32.mrf.mxu0  ;;  %v1879_v31 = vpop.f32.mrf.mxu1 }
  0xfc   :  { %v479_v33 = vadd.f32 %v1587_v27, %v478_v22  ;;  %1269 = vmatmul.msk.bf16.gmra.mxu3 %vm235_vm1, %v229_v20 }
  0xfe   :  { %v776_v46 = vmax.f32 %v479_v33, 0.0  ;;  %v937_v33 = vpack.c.bf16 %v770_v19, %v769_v21 }
  0xff   :  { %v1938_v51 = vpop.f32.mrf.mxu3 }
 0x100   :  { %v940_v62 = vpack.c.bf16 %v776_v46, %v775_v36  ;;  %v1930_v37 = vpop.f32.mrf.mxu2  ;;  %v103_v36 = vld [vmem:[%s2365_s1 + $0x208] sm:$0xff] }
 0x101   :  { %v198_v46 = vpack.c.bf16 %v103_v36, %v102_v26  ;;  %v889_v36 = vlaneseq }
 0x102   :  { %997 = vmatpush.bf16.msrb.mxu1 %v940_v62  ;;  %v183_v62 = vpack.c.bf16 %v73_v58, %v72_v56 }
 0x103   :  { %v481_v8 = vpop.f32.mrf.mxu0  ;;  %v1901_v3 = vpop.f32.mrf.mxu1  ;;  %1238 = vmatmul.msk.bf16.gmra.mxu1 %vm235_vm1, %v198_v46  ;;  %v2000_v58 = vshrl.u32 %v889_v36, 7 }
 0x104   :  { %v482_v57 = vadd.f32 %v1587_v27, %v481_v8  ;;  %v130_v8 = vld [vmem:[%s2365_s1 + $0x2e0] sm:$0xff] }
 0x106   :  { %1222 = vmatmul.msk.bf16.gmra.mxu0 %vm235_vm1, %v182_v16  ;;  %998 = vmatpush.bf16.msrb.mxu1 %v939_v10  ;;  %v777_v55 = vmax.f32 %v482_v57, 0.0  ;;  %v133_v57 = vld [vmem:[%s2365_s1 + $0x2f8] sm:$0xff] }
 0x107   :  { %v1952_v16 = vpop.f32.mrf.mxu3 }
 0x108   :  { %v1950_v6 = vpop.f32.mrf.mxu2 }
 0x10a   :  { %999 = vmatpush.bf16.msrb.mxu1 %v938_v53 }
 0x10b   :  { %v483_v22 = vpop.f32.mrf.mxu0  ;;  %v1927_v32 = vpop.f32.mrf.mxu1 }
 0x10c   :  { %v484_v18 = vadd.f32 %v1587_v27, %v483_v22 }
 0x10e   :  { %v778_v30 = vmax.f32 %v484_v18, 0.0  ;;  %1000 = vmatpush.bf16.msrb.mxu1 %v937_v33 }
 0x10f   :  { %v1968_v41 = vpop.f32.mrf.mxu3 }
 0x110   :  { %v1947_v59 = vpack.c.bf16 %v778_v30, %v777_v55  ;;  %v1998_v55 = vld [vmem:[%s2364_s0] sm:$0xff] }
 0x112   :  { %1001 = vmatpush.bf16.msrb.mxu1 %v1718_v47  ;;  %v212_v47 = vpack.c.bf16 %v131_v4, %v130_v8 }
 0x113   :  { %v486_v0 = vpop.f32.mrf.mxu0  ;;  %v591_v61 = vpop.f32.mrf.mxu1 }
 0x114   :  { %1252 = vmatmul.msk.bf16.gmra.mxu2 %vm235_vm1, %v212_v47  ;;  %v487_v7 = vadd.f32 %v1587_v27, %v486_v0  ;;  %v592_v33 = vadd.f32 %v1587_v27, %v591_v61  ;;  %v587_v0 = vadd.f32 %v1587_v27, %v1901_v3  ;;  %v76_v3 = vld [vmem:[%s2365_s1 + $0x130] sm:$0xff] }
 0x116   :  { %1223 = vmatmul.msk.bf16.gmra.mxu0 %vm235_vm1, %v183_v62  ;;  %1002 = vmatpush.bf16.msrb.mxu1 %v1687_v23  ;;  %v1966_v23 = vpop.f32.mrf.mxu2  ;;  %v779_v12 = vmax.f32 %v487_v7, 0.0  ;;  %v892_v62 = vperm.slane %v1998_v55, 0  ;;  %v589_v7 = vadd.f32 %v1587_v27, %v1927_v32 }
 0x117   :  { %v1981_v21 = vpop.f32.mrf.mxu3 }
 0x118   :  { %vm900_vm2 = vcmp.eq.s32.totalorder %v892_v62, %v2000_v58 }
 0x119   :  { %vm1278_vm3 = vmpackc.low %vm900_vm2, %vm900_vm2  ;;  %vm36_vm2 = vcmask 25600  }
 0x11a   :  { %1003 = vmatpush.bf16.msrb.mxu1 %v1657_v2  ;;  %v75_v2 = vld [vmem:[%s2365_s1 + $0x128] sm:$0xff] }
 0x11b   :  { %v488_v10 = vpop.f32.mrf.mxu0  ;;  %v593_v43 = vpop.f32.mrf.mxu1  ;;  %v184_v50 = vpack.c.bf16 %v75_v2, %v74_v14  ;;  %v77_v2 = vld [vmem:[%s2365_s1 + $0x138] sm:$0xff] }
 0x11c   :  { %v489_v15 = vadd.f32 %v1587_v27, %v488_v10  ;;  %v594_v26 = vadd.f32 %v1587_v27, %v593_v43  ;;  %v821_v10 = vmax.f32 %v592_v33, 0.0  ;;  %v185_v33 = vpack.c.bf16 %v77_v2, %v76_v3 }
 0x11d   :  { %v564_v3 = vadd.f32 %v1587_v27, %v1707_v39 }
 0x11e   :  { %v780_v1 = vmax.f32 %v489_v15, 0.0  ;;  %1004 = vmatpush.bf16.msrb.mxu1 %v1621_v44  ;;  %v1979_v20 = vpop.f32.mrf.mxu2  ;;  %v132_v44 = vld [vmem:[%s2365_s1 + $0x2f0] sm:$0xff]  ;;  %v822_v43 = vmax.f32 %v594_v26, 0.0 }
 0x11f   :  { %v213_v22 = vpack.c.bf16 %v133_v57, %v132_v44  ;;  %v2012_v15 = vpop.f32.mrf.mxu3  ;;  %v584_v44 = vadd.f32 %v1587_v27, %v1879_v31  ;;  %v819_v57 = vmax.f32 %v587_v0, 0.0 }
 0x120   :  { %v1977_v17 = vpack.c.bf16 %v780_v1, %v779_v12 }
 0x123   :  { %v491_v19 = vpop.f32.mrf.mxu0  ;;  %v596_v53 = vpop.f32.mrf.mxu1 }
 0x124   :  { %v597_v18 = vadd.f32 %v1587_v27, %v596_v53  ;;  %1253 = vmatmul.msk.bf16.gmra.mxu2 %vm235_vm1, %v213_v22  ;;  %v492_v46 = vadd.f32 %v1587_v27, %v491_v19  ;;  %v582_v53 = vadd.f32 %v1587_v27, %v1839_v49  ;;  %v820_v22 = vmax.f32 %v589_v7, 0.0 }
 0x126   :  { %1224 = vmatmul.msk.bf16.gmra.mxu0 %vm235_vm1, %v184_v50  ;;  %v823_v8 = vmax.f32 %v597_v18, 0.0  ;;  %v2007_v47 = vpop.f32.mrf.mxu2  ;;  %v781_v12 = vmax.f32 %v492_v46, 0.0  ;;  %v1330_v50 = vmov 1.0|1.0   ;;  %v963_v18 = vpack.c.bf16 %v822_v43, %v821_v10  ;;  %v78_v10 = vld [vmem:[%s2365_s1 + $0x140] sm:$0xff]  ;;  %v79_v43 = vld [vmem:[%s2365_s1 + $0x148] sm:$0xff] }
 0x127   :  { %1279 = vmatmul.msk.bf16.vlgmr.msrb.gmra.mxu1 %vm1278_vm3, %v1330_v50  ;;  %v2029_v46 = vpop.f32.mrf.mxu3  ;;  %v962_v62 = vpack.c.bf16 %v820_v22, %v819_v57  ;;  %v186_v2 = vpack.c.bf16 %v79_v43, %v78_v10  ;;  %v719_v57 = vadd.f32 %v1587_v27, %v1952_v16  ;;  %v702_v43 = vadd.f32 %v1587_v27, %v1786_v52 }
 0x12b   :  { %v493_v30 = vpop.f32.mrf.mxu0  ;;  %v598_v56 = vpop.f32.mrf.mxu1 }
 0x12c   :  { %v494_v61 = vadd.f32 %v1587_v27, %v493_v30  ;;  %v599_v4 = vadd.f32 %v1587_v27, %v598_v56  ;;  %v817_v30 = vmax.f32 %v582_v53, 0.0  ;;  %v818_v56 = vmax.f32 %v584_v44, 0.0 }
 0x12d   :  { %v717_v44 = vadd.f32 %v1587_v27, %v1938_v51  ;;  %v872_v51 = vmax.f32 %v719_v57, 0.0 }
 0x12e   :  { %v782_v1 = vmax.f32 %v494_v61, 0.0  ;;  %v824_v14 = vmax.f32 %v599_v4, 0.0  ;;  %v2027_v36 = vpop.f32.mrf.mxu2  ;;  %v961_v49 = vpack.c.bf16 %v818_v56, %v817_v30 }
 0x130   :  { %v964_v32 = vpack.c.bf16 %v824_v14, %v823_v8  ;;  %v2021_v19 = vpack.c.bf16 %v782_v1, %v781_v12  ;;  %v2040_v12 = vpop.f32.mrf.mxu3  ;;  %v562_v14 = vadd.f32 %v1587_v27, %v1689_v28 }
 0x132   :  { %1036 = vmatpush.bf16.msra.mxu1 %v964_v32  ;;  %v722_v32 = vadd.f32 %v1587_v27, %v1968_v41  ;;  %v809_v39 = vmax.f32 %v562_v14, 0.0  ;;  %v724_v41 = vadd.f32 %v1587_v27, %v1981_v21 }
 0x133   :  { %v496_v26 = vpop.f32.mrf.mxu0 }
 0x134   :  { %v497_v61 = vadd.f32 %v1587_v27, %v496_v26  ;;  %v871_v26 = vmax.f32 %v717_v44, 0.0  ;;  %v874_v16 = vmax.f32 %v724_v41, 0.0  ;;  %v865_v44 = vmax.f32 %v702_v43, 0.0 }
 0x136   :  { %1225 = vmatmul.msk.bf16.gmra.mxu0 %vm235_vm1, %v185_v33  ;;  %1037 = vmatpush.bf16.msra.mxu1 %v963_v18  ;;  %v641_v8 = vpop.f32.mrf.mxu2  ;;  %v783_v4 = vmax.f32 %v497_v61, 0.0  ;;  %v810_v33 = vmax.f32 %v564_v3, 0.0 }
 0x137   :  { %v642_v28 = vadd.f32 %v1587_v27, %v641_v8  ;;  %v988_v8 = vpack.c.bf16 %v872_v51, %v871_v26 }
 0x139   :  { %v841_v30 = vmax.f32 %v642_v28, 0.0 }
 0x13a   :  { %1038 = vmatpush.bf16.msra.mxu1 %v962_v62  ;;  %v712_v62 = vadd.f32 %v1587_v27, %v1885_v38  ;;  %v709_v38 = vadd.f32 %v1587_v27, %v1849_v63 }
 0x13b   :  { %v498_v31 = vpop.f32.mrf.mxu0 }
 0x13c   :  { %v499_v0 = vadd.f32 %v1587_v27, %v498_v31  ;;  %v733_v31 = vpop.f32.mrf.mxu3  ;;  %v869_v10 = vmax.f32 %v712_v62, 0.0  ;;  %v868_v3 = vmax.f32 %v709_v38, 0.0  ;;  %v732_v62 = vadd.f32 %v1587_v27, %v2040_v12 }
 0x13e   :  { %v784_v7 = vmax.f32 %v499_v0, 0.0  ;;  %1039 = vmatpush.bf16.msra.mxu1 %v961_v49  ;;  %v643_v22 = vpop.f32.mrf.mxu2  ;;  %v714_v49 = vadd.f32 %v1587_v27, %v1907_v11  ;;  %v957_v0 = vpack.c.bf16 %v810_v33, %v809_v39 }
 0x13f   :  { %v644_v18 = vadd.f32 %v1587_v27, %v643_v22 }
 0x140   :  { %v2042_v1 = vpack.c.bf16 %v784_v7, %v783_v4  ;;  %v707_v7 = vadd.f32 %v1587_v27, %v1827_v34  ;;  %v870_v11 = vmax.f32 %v714_v49, 0.0 }
 0x141   :  { %v842_v56 = vmax.f32 %v644_v18, 0.0 }
 0x142   :  { %1040 = vmatpush.bf16.msra.mxu1 %v1837_v40  ;;  %v873_v40 = vmax.f32 %v722_v32, 0.0  ;;  %v867_v14 = vmax.f32 %v707_v7, 0.0  ;;  %v727_v32 = vadd.f32 %v1587_v27, %v2012_v15  ;;  %v734_v7 = vadd.f32 %v1587_v27, %v733_v31 }
 0x143   :  { %v2051_v53 = vpop.f32.mrf.mxu0  ;;  %v2067_v61 = vpack.c.bf16 %v842_v56, %v841_v30 }
 0x144   :  { %v736_v63 = vpop.f32.mrf.mxu3  ;;  %v986_v28 = vpack.c.bf16 %v868_v3, %v867_v14  ;;  %v875_v39 = vmax.f32 %v727_v32, 0.0 }
 0x145   :  { %v737_v3 = vadd.f32 %v1587_v27, %v736_v63 }
 0x146   :  { %1226 = vmatmul.msk.bf16.gmra.mxu0 %vm235_vm1, %v186_v2  ;;  %1041 = vmatpush.bf16.msra.mxu1 %v1796_v60  ;;  %v2070_v60 = vpack.c.bf16 %v874_v16, %v873_v40  ;;  %v646_v4 = vpop.f32.mrf.mxu2  ;;  %v987_v2 = vpack.c.bf16 %v870_v11, %v869_v10 }
 0x147   :  { %v647_v18 = vadd.f32 %v1587_v27, %v646_v4  ;;  %v877_v4 = vmax.f32 %v732_v62, 0.0 }
 0x149   :  { %v843_v33 = vmax.f32 %v647_v18, 0.0 }
 0x14a   :  { %1042 = vmatpush.bf16.msra.mxu1 %v1755_v13  ;;  %v704_v13 = vadd.f32 %v1587_v27, %v1804_v5  ;;  %v729_v5 = vadd.f32 %v1587_v27, %v2029_v46 }
 0x14b   :  { %v2072_v21 = vpop.f32.mrf.mxu0 }
 0x14c   :  { %v866_v22 = vmax.f32 %v704_v13, 0.0  ;;  %v876_v15 = vmax.f32 %v729_v5, 0.0  ;;  %v738_v16 = vpop.f32.mrf.mxu3 }
 0x14e   :  { %1043 = vmatpush.bf16.msra.mxu1 %v957_v0  ;;  %v648_v57 = vpop.f32.mrf.mxu2  ;;  %v985_v41 = vpack.c.bf16 %v866_v22, %v865_v44  ;;  %v2092_v51 = vpack.c.bf16 %v876_v15, %v875_v39  ;;  %v879_v44 = vmax.f32 %v737_v3, 0.0 }
 0x14f   :  { %v649_v52 = vadd.f32 %v1587_v27, %v648_v57  ;;  %v739_v57 = vadd.f32 %v1587_v27, %v738_v16 }
 0x151   :  { %v844_v40 = vmax.f32 %v649_v52, 0.0  ;;  %v880_v18 = vmax.f32 %v739_v57, 0.0 }
 0x152   :  { %1075 = vmatpush.bf16.msrb.mxu1 %v988_v8 }
 0x153   :  { %v2084_v34 = vpop.f32.mrf.mxu0  ;;  %v2090_v26 = vpack.c.bf16 %v844_v40, %v843_v33  ;;  %v2118_v39 = vpack.c.bf16 %v880_v18, %v879_v44 }
 0x154   :  { %v2102_v11 = vpop.f32.mrf.mxu3 }
 0x156   :  { %1076 = vmatpush.bf16.msrb.mxu1 %v987_v2  ;;  %v651_v56 = vpop.f32.mrf.mxu2 }
 0x157   :  { %v652_v0 = vadd.f32 %v1587_v27, %v651_v56 }
 0x159   :  { %v845_v38 = vmax.f32 %v652_v0, 0.0  ;;  %v507_v0 = vadd.f32 %v1587_v27, %v2084_v34  ;;  %v2137_v34 = vld [vmem:[%s2367_s3] ss:$0 sm:$0xff] }
 0x15a   :  { %1077 = vmatpush.bf16.msrb.mxu1 %v986_v28  ;;  %v639_v18 = vadd.f32 %v2137_v34, %v2027_v36 }
 0x15b   :  { %v508_v30 = vpop.f32.mrf.mxu0 }
 0x15c   :  { %v2109_v14 = vpop.f32.mrf.mxu3  ;;  %v509_v16 = vadd.f32 %v1587_v27, %v508_v30 }
 0x15e   :  { %1078 = vmatpush.bf16.msrb.mxu1 %v985_v41  ;;  %v653_v46 = vpop.f32.mrf.mxu2 }
 0x15f   :  { %v654_v8 = vadd.f32 %v1587_v27, %v653_v46 }
 0x161   :  { %v846_v10 = vmax.f32 %v654_v8, 0.0 }
 0x162   :  { %1079 = vmatpush.bf16.msrb.mxu1 %v1887_v45  ;;  %v878_v45 = vmax.f32 %v734_v7, 0.0  ;;  %v504_v7 = vadd.f32 %v1587_v27, %v2072_v21 }
 0x163   :  { %v511_v49 = vpop.f32.mrf.mxu0  ;;  %v2104_v43 = vpack.c.bf16 %v846_v10, %v845_v38  ;;  %v788_v38 = vmax.f32 %v509_v16, 0.0  ;;  %v624_v16 = vadd.f32 %v2137_v34, %v1905_v24 }
 0x164   :  { %v2106_v12 = vpack.c.bf16 %v878_v45, %v877_v4  ;;  %v2120_v63 = vpop.f32.mrf.mxu3  ;;  %v512_v15 = vadd.f32 %v1587_v27, %v511_v49  ;;  %v502_v49 = vadd.f32 %v1587_v27, %v2051_v53  ;;  %v786_v30 = vmax.f32 %v504_v7, 0.0 }
 0x165   :  { %v834_v7 = vmax.f32 %v624_v16, 0.0 }
 0x166   :  { %1080 = vmatpush.bf16.msrb.mxu1 %v1829_v35  ;;  %v656_v13 = vpop.f32.mrf.mxu2  ;;  %v789_v8 = vmax.f32 %v512_v15, 0.0  ;;  %v785_v3 = vmax.f32 %v502_v49, 0.0 }
 0x16a   :  { %1081 = vmatpush.bf16.msrb.mxu1 %v1788_v54  ;;  %v657_v54 = vadd.f32 %v1587_v27, %v656_v13 }
 0x16b   :  { %v513_v35 = vpop.f32.mrf.mxu0 }
 0x16c   :  { %v847_v22 = vmax.f32 %v657_v54, 0.0  ;;  %v514_v33 = vadd.f32 %v1587_v27, %v513_v35  ;;  %v2130_v45 = vpop.f32.mrf.mxu3  ;;  %v787_v35 = vmax.f32 %v507_v0, 0.0  ;;  %v945_v54 = vpack.c.bf16 %v786_v30, %v785_v3 }
 0x16e   :  { %1082 = vmatpush.bf16.msrb.mxu1 %v1747_v9  ;;  %v658_v2 = vpop.f32.mrf.mxu2  ;;  %v790_v62 = vmax.f32 %v514_v33, 0.0  ;;  %v946_v13 = vpack.c.bf16 %v788_v38, %v787_v35  ;;  %v634_v33 = vadd.f32 %v2137_v34, %v1979_v20 }
 0x16f   :  { %v659_v32 = vadd.f32 %v1587_v27, %v658_v2 }
 0x170   :  { %v947_v10 = vpack.c.bf16 %v790_v62, %v789_v8 }
 0x171   :  { %v848_v28 = vmax.f32 %v659_v32, 0.0 }
 0x173   :  { %v516_v31 = vpop.f32.mrf.mxu0  ;;  %v2115_v52 = vpack.c.bf16 %v848_v28, %v847_v22  ;;  %v637_v28 = vadd.f32 %v2137_v34, %v2007_v47 }
 0x174   :  { %v517_v9 = vadd.f32 %v1587_v27, %v516_v31 }
 0x176   :  { %v791_v41 = vmax.f32 %v517_v9, 0.0  ;;  %v2141_v53 = vpop.f32.mrf.mxu2  ;;  %v893_v9 = vperm.slane %v1998_v55, 1 }
 0x178   :  { %vm901_vm4 = vcmp.eq.s32.totalorder %v893_v9, %v2000_v58 }
 0x179   :  { %vm1280_vm5 = vmpackc.low %vm901_vm4, %vm901_vm4 }
 0x17b   :  { %v518_v5 = vpop.f32.mrf.mxu0 }
 0x17c   :  { %v519_v40 = vadd.f32 %v1587_v27, %v518_v5  ;;  %v751_v27 = vpop.f32.mrf.mxu3  ;;  %v632_v5 = vadd.f32 %v2137_v34, %v1966_v23  ;;  %v629_v23 = vadd.f32 %v2137_v34, %v1950_v6 }
 0x17e   :  { %v792_v56 = vmax.f32 %v519_v40, 0.0  ;;  %v839_v40 = vmax.f32 %v637_v28, 0.0  ;;  %v837_v36 = vmax.f32 %v632_v5, 0.0 }
 0x180   :  { %v948_v46 = vpack.c.bf16 %v792_v56, %v791_v41  ;;  %v2159_v41 = vpop.f32.mrf.mxu2  ;;  %v838_v56 = vmax.f32 %v634_v33, 0.0 }
 0x182   :  { %1010 = vmatpush.bf16.msrb.mxu2 %v948_v46  ;;  %v836_v46 = vmax.f32 %v629_v23, 0.0  ;;  %v971_v0 = vpack.c.bf16 %v838_v56, %v837_v36 }
 0x183   :  { %v521_v4 = vpop.f32.mrf.mxu0 }
 0x184   :  { %v522_v31 = vadd.f32 %v2137_v34, %v521_v4  ;;  %v753_v15 = vpop.f32.mrf.mxu3 }
 0x186   :  { %1011 = vmatpush.bf16.msrb.mxu2 %v947_v10  ;;  %v793_v32 = vmax.f32 %v522_v31, 0.0 }
 0x188   :  { %v2176_v4 = vpop.f32.mrf.mxu2 }
 0x18a   :  { %1012 = vmatpush.bf16.msrb.mxu2 %v946_v13 }
 0x18b   :  { %v523_v21 = vpop.f32.mrf.mxu0 }
 0x18c   :  { %v524_v2 = vadd.f32 %v2137_v34, %v523_v21  ;;  %v756_v8 = vpop.f32.mrf.mxu3 }
 0x18d   :  { %v757_v3 = vadd.f32 %v2137_v34, %v756_v8 }
 0x18e   :  { %v794_v44 = vmax.f32 %v524_v2, 0.0  ;;  %1013 = vmatpush.bf16.msrb.mxu2 %v945_v54 }
 0x18f   :  { %v887_v28 = vmax.f32 %v757_v3, 0.0 }
 0x190   :  { %v2143_v57 = vpack.c.bf16 %v794_v44, %v793_v32  ;;  %v2178_v35 = vpop.f32.mrf.mxu2  ;;  %v752_v32 = vadd.f32 %v2137_v34, %v751_v27  ;;  %v754_v44 = vadd.f32 %v2137_v34, %v753_v15  ;;  %v742_v15 = vadd.f32 %v2137_v34, %v2102_v11 }
 0x192   :  { %1014 = vmatpush.bf16.msrb.mxu2 %v2042_v1  ;;  %v840_v1 = vmax.f32 %v639_v18, 0.0  ;;  %v885_v9 = vmax.f32 %v752_v32, 0.0  ;;  %v886_v33 = vmax.f32 %v754_v44, 0.0  ;;  %v881_v56 = vmax.f32 %v742_v15, 0.0 }
 0x193   :  { %v2146_v22 = vpop.f32.mrf.mxu0 }
 0x194   :  { %v972_v20 = vpack.c.bf16 %v840_v1, %v839_v40  ;;  %v758_v49 = vpop.f32.mrf.mxu3  ;;  %v747_v1 = vadd.f32 %v2137_v34, %v2120_v63  ;;  %v995_v27 = vpack.c.bf16 %v886_v33, %v885_v9  ;;  %v898_v33 = vperm.slane %v1998_v55, 6 }
 0x195   :  { %v759_v31 = vadd.f32 %v2137_v34, %v758_v49 }
 0x196   :  { %1015 = vmatpush.bf16.msrb.mxu2 %v2021_v19  ;;  %v627_v19 = vadd.f32 %v2137_v34, %v1930_v37  ;;  %v601_v37 = vpop.f32.mrf.mxu1  ;;  %v883_v23 = vmax.f32 %v747_v1, 0.0  ;;  %vm906_vm13 = vcmp.eq.s32.totalorder %v898_v33, %v2000_v58  ;;  %v1153_v33 = vld [vmem:[%s2370_s6 + $0x28] sm:$0xff] }
 0x197   :  { %v602_v30 = vadd.f32 %v2137_v34, %v601_v37  ;;  %v888_v18 = vmax.f32 %v759_v31, 0.0  ;;  %vm1290_vm15 = vmpackc.low %vm906_vm13, %vm906_vm13 }
 0x198   :  { %v835_v62 = vmax.f32 %v627_v19, 0.0  ;;  %v2189_v5 = vpop.f32.mrf.mxu2 }
 0x199   :  { %v825_v2 = vmax.f32 %v602_v30, 0.0  ;;  %v996_v40 = vpack.c.bf16 %v888_v18, %v887_v28 }
 0x19a   :  { %1016 = vmatpush.bf16.msrb.mxu2 %v1977_v17  ;;  %v622_v17 = vadd.f32 %v2137_v34, %v1883_v29  ;;  %v970_v38 = vpack.c.bf16 %v836_v46, %v835_v62  ;;  %v896_v62 = vperm.slane %v1998_v55, 4 }
 0x19b   :  { %v2161_v47 = vpop.f32.mrf.mxu0 }
 0x19c   :  { %vm904_vm6 = vcmp.eq.s32.totalorder %v896_v62, %v2000_v58 }
 0x19d   :  { %vm1286_vm7 = vmpackc.low %vm904_vm6, %vm904_vm6 }
 0x19e   :  { %1017 = vmatpush.bf16.msrb.mxu2 %v1947_v59  ;;  %v833_v59 = vmax.f32 %v622_v17, 0.0  ;;  %v603_v24 = vpop.f32.mrf.mxu1 }
 0x19f   :  { %v604_v13 = vadd.f32 %v2137_v34, %v603_v24 }
 0x1a0   :  { %v969_v29 = vpack.c.bf16 %v834_v7, %v833_v59  ;;  %v673_v63 = vpop.f32.mrf.mxu2 }
 0x1a1   :  { %1281 = vmatmul.msk.bf16.vlgmr.msrb.gmra.mxu2 %vm1280_vm5, %v1330_v50  ;;  %v826_v54 = vmax.f32 %v604_v13, 0.0  ;;  %v674_v18 = vadd.f32 %v2137_v34, %v673_v63 }
 0x1a2   :  { %1049 = vmatpush.bf16.msra.mxu2 %v972_v20 }
 0x1a3   :  { %v2174_v6 = vpop.f32.mrf.mxu0 }
 0x1a4   :  { %v532_v30 = vadd.f32 %v2137_v34, %v2174_v6 }
 0x1a6   :  { %1050 = vmatpush.bf16.msra.mxu2 %v971_v0 }
 0x1a8   :  { %v676_v8 = vpop.f32.mrf.mxu2 }
 0x1a9   :  { %v677_v6 = vadd.f32 %v2137_v34, %v676_v8  ;;  %v1114_v8 = vld [vmem:[%s2368_s4 + $0x38] sm:$0xff] }
 0x1aa   :  { %1051 = vmatpush.bf16.msra.mxu2 %v970_v38 }
 0x1ab   :  { %v533_v10 = vpop.f32.mrf.mxu0 }
 0x1ae   :  { %1052 = vmatpush.bf16.msra.mxu2 %v969_v29  ;;  %v534_v29 = vadd.f32 %v2137_v34, %v533_v10  ;;  %v797_v10 = vmax.f32 %v532_v30, 0.0  ;;  %v1110_v30 = vld [vmem:[%s2368_s4 + $0x18] sm:$0xff] }
 0x1b0   :  { %v798_v3 = vmax.f32 %v534_v29, 0.0 }
 0x1b2   :  { %1053 = vmatpush.bf16.msra.mxu2 %v1871_v48  ;;  %v965_v48 = vpack.c.bf16 %v826_v54, %v825_v2  ;;  %v678_v2 = vpop.f32.mrf.mxu2 }
 0x1b3   :  { %v536_v21 = vpop.f32.mrf.mxu0  ;;  %v679_v32 = vadd.f32 %v2137_v34, %v678_v2  ;;  %v1161_v2 = vld [vmem:[%s2370_s6 + $0x68] sm:$0xff] }
 0x1b4   :  { %v537_v59 = vadd.f32 %v2137_v34, %v536_v21  ;;  %v527_v21 = vadd.f32 %v2137_v34, %v2146_v22  ;;  %v672_v22 = vadd.f32 %v2137_v34, %v2189_v5  ;;  %v669_v5 = vadd.f32 %v2137_v34, %v2178_v35 }
 0x1b5   :  { %v664_v35 = vadd.f32 %v2137_v34, %v2159_v41 }
 0x1b6   :  { %1054 = vmatpush.bf16.msra.mxu2 %v1823_v25  ;;  %v749_v25 = vadd.f32 %v2137_v34, %v2130_v45  ;;  %v799_v13 = vmax.f32 %v537_v59, 0.0  ;;  %v795_v44 = vmax.f32 %v527_v21, 0.0  ;;  %v853_v1 = vmax.f32 %v672_v22, 0.0  ;;  %v1163_v21 = vld [vmem:[%s2370_s6 + $0x78] sm:$0xff] }
 0x1b7   :  { %v1155_v22 = vld [vmem:[%s2370_s6 + $0x38] sm:$0xff] }
 0x1b8   :  { %v884_v36 = vmax.f32 %v749_v25, 0.0  ;;  %v854_v25 = vmax.f32 %v674_v18, 0.0 }
 0x1ba   :  { %1055 = vmatpush.bf16.msra.mxu2 %v1780_v42  ;;  %v744_v42 = vadd.f32 %v2137_v34, %v2109_v14  ;;  %v994_v17 = vpack.c.bf16 %v884_v36, %v883_v23  ;;  %v895_v14 = vperm.slane %v1998_v55, 3  ;;  %v979_v23 = vpack.c.bf16 %v854_v25, %v853_v1  ;;  %v1152_v1 = vld [vmem:[%s2370_s6 + $0x20] sm:$0xff] }
 0x1bb   :  { %v538_v19 = vpop.f32.mrf.mxu0 }
 0x1bc   :  { %v882_v20 = vmax.f32 %v744_v42, 0.0  ;;  %v539_v0 = vadd.f32 %v2137_v34, %v538_v19  ;;  %vm903_vm8 = vcmp.eq.s32.totalorder %v895_v14, %v2000_v58  ;;  %v852_v42 = vmax.f32 %v669_v5, 0.0 }
 0x1bd   :  { %vm1284_vm9 = vmpackc.low %vm903_vm8, %vm903_vm8 }
 0x1be   :  { %1056 = vmatpush.bf16.msra.mxu2 %v965_v48  ;;  %v993_v45 = vpack.c.bf16 %v882_v20, %v881_v56  ;;  %1285 = vmatmul.msk.bf16.vlgmr.msra.gmra.mxu1 %vm1284_vm9, %v1330_v50  ;;  %v800_v24 = vmax.f32 %v539_v0, 0.0  ;;  %v855_v48 = vmax.f32 %v677_v6, 0.0  ;;  %v850_v56 = vmax.f32 %v664_v35, 0.0  ;;  %v1115_v0 = vld [vmem:[%s2368_s4 + $0x40] sm:$0xff]  ;;  %v1159_v6 = vld [vmem:[%s2370_s6 + $0x58] sm:$0xff]  ;;  %v1150_v35 = vld [vmem:[%s2370_s6 + $0x10] sm:$0xff] }
 0x1bf   :  { %1168 = vmatpush.msra.mxu1 %v1163_v21 }
 0x1c0   :  { %v952_v31 = vpack.c.bf16 %v800_v24, %v799_v13  ;;  %v1112_v24 = vld [vmem:[%s2368_s4 + $0x28] sm:$0xff]  ;;  %v1109_v13 = vld [vmem:[%s2368_s4 + $0x10] sm:$0xff] }
 0x1c1   :  { %1287 = vmatmul.msk.bf16.vlgmr.msra.gmra.mxu2 %vm1286_vm7, %v1330_v50 }
 0x1c2   :  { %1088 = vmatpush.bf16.msrb.mxu2 %v996_v40  ;;  %v667_v40 = vadd.f32 %v2137_v34, %v2176_v4  ;;  %v662_v4 = vadd.f32 %v2137_v34, %v2141_v53  ;;  %v897_v53 = vperm.slane %v1998_v55, 5 }
 0x1c3   :  { %v541_v16 = vpop.f32.mrf.mxu0 }
 0x1c4   :  { %v542_v11 = vadd.f32 %v2137_v34, %v541_v16  ;;  %v851_v15 = vmax.f32 %v667_v40, 0.0  ;;  %v849_v36 = vmax.f32 %v662_v4, 0.0  ;;  %vm905_vm0 = vcmp.eq.s32.totalorder %v897_v53, %v2000_v58 }
 0x1c5   :  { %vm1288_vm1 = vmpackc.low %vm905_vm0, %vm905_vm0 }
 0x1c6   :  { %1089 = vmatpush.bf16.msrb.mxu2 %v995_v27  ;;  %v801_v7 = vmax.f32 %v542_v11, 0.0  ;;  %v1006_v27 = vpop.f32.mrf.mxu1  ;;  %v1116_v11 = vld [vmem:[%s2368_s4 + $0x48] sm:$0xff] }
 0x1ca   :  { %1090 = vmatpush.bf16.msrb.mxu2 %v994_v17  ;;  %v977_v17 = vpack.c.bf16 %v850_v56, %v849_v36 }
 0x1cb   :  { %v543_v46 = vpop.f32.mrf.mxu0 }
 0x1cc   :  { %v544_v37 = vadd.f32 %v2137_v34, %v543_v46 }
 0x1ce   :  { %1091 = vmatpush.bf16.msrb.mxu2 %v993_v45  ;;  %v802_v38 = vmax.f32 %v544_v37, 0.0  ;;  %1291 = vmatmul.msk.bf16.vlgmr.msrb.gmra.mxu1 %vm1290_vm15, %v1330_v50  ;;  %v1008_v20 = vpop.f32.mrf.mxu1  ;;  %v1117_v45 = vld [vmem:[%s2368_s4 + $0x50] sm:$0xff]  ;;  %v1331_v37 = vmov 0.0  }
 0x1cf   :  { %35 = vst [vmem:[#allocation2] sm:$0x3] %v1331_v37  ;;  %v1302_v20 = vld [vmem:[%s2371_s7] ss:$0 sm:$0xff] }
 0x1d0   :  { %v953_v49 = vpack.c.bf16 %v802_v38, %v801_v7  ;;  %v1113_v7 = vld [vmem:[%s2368_s4 + $0x30] sm:$0xff]  ;;  %37 = vst.msk [vmem:[#allocation3] sm:$0x3] %vm36_vm2, %v1331_v37 }
 0x1d2   :  { %1092 = vmatpush.bf16.msrb.mxu2 %v2118_v39  ;;  %1026 = vmatpush.bf16.msrb.mxu3 %v953_v49  ;;  %v529_v39 = vadd.f32 %v2137_v34, %v2161_v47  ;;  %v894_v47 = vperm.slane %v1998_v55, 2  ;;  %v1111_v49 = vld [vmem:[%s2368_s4 + $0x20] sm:$0xff] }
 0x1d4   :  { %v796_v54 = vmax.f32 %v529_v39, 0.0  ;;  %vm2229_vm12 = vcmp.eq.s32.totalorder %v894_v47, %v2000_v58  ;;  %v1157_v47 = vld [vmem:[%s2370_s6 + $0x48] sm:$0xff] }
 0x1d5   :  { %vm1282_vm14 = vmpackc.low %vm2229_vm12, %vm2229_vm12 }
 0x1d6   :  { %1093 = vmatpush.bf16.msrb.mxu2 %v2106_v12  ;;  %1027 = vmatpush.bf16.msrb.mxu3 %v952_v31  ;;  %v951_v12 = vpack.c.bf16 %v798_v3, %v797_v10  ;;  %v950_v28 = vpack.c.bf16 %v796_v54, %v795_v44  ;;  %v1108_v3 = vld [vmem:[%s2368_s4 + $0x8] sm:$0xff]  ;;  %v1107_v31 = vld [vmem:[%s2368_s4] sm:$0xff]  ;;  %v1162_v10 = vld [vmem:[%s2370_s6 + $0x70] sm:$0xff] }
 0x1d7   :  { %1169 = vmatpush.msra.mxu1 %v1162_v10  ;;  %v1160_v54 = vld [vmem:[%s2370_s6 + $0x60] sm:$0xff] }
 0x1d8   :  { %v932_v40 = vld [vmem:[#allocation2] sm:$0x3] }
 0x1d9   :  { %1170 = vmatpush.msra.mxu1 %v1161_v2 }
 0x1da   :  { %1094 = vmatpush.bf16.msrb.mxu2 %v2092_v51  ;;  %1028 = vmatpush.bf16.msrb.mxu3 %v951_v12  ;;  %v899_v51 = vperm.slane %v1998_v55, 7  ;;  %v1121_v55 = vld [vmem:[%s2368_s4 + $0x70] sm:$0xff] }
 0x1db   :  { %1171 = vmatpush.msra.mxu1 %v1160_v54 }
 0x1dc   :  { %vm907_vm10 = vcmp.eq.s32.totalorder %v899_v51, %v2000_v58  ;;  %v1120_v58 = vld [vmem:[%s2368_s4 + $0x68] sm:$0xff]  ;;  %v1156_v51 = vld [vmem:[%s2370_s6 + $0x40] sm:$0xff] }
 0x1dd   :  { %vm1292_vm11 = vmpackc.low %vm907_vm10, %vm907_vm10  ;;  %1172 = vmatpush.msra.mxu1 %v1159_v6 }
 0x1de   :  { %1095 = vmatpush.bf16.msrb.mxu2 %v2070_v60  ;;  %v856_v60 = vmax.f32 %v679_v32, 0.0  ;;  %1029 = vmatpush.bf16.msrb.mxu3 %v950_v28  ;;  %v1158_v32 = vld [vmem:[%s2370_s6 + $0x50] sm:$0xff] }
 0x1df   :  { %1173 = vmatpush.msra.mxu1 %v1158_v32 }
 0x1e0   :  { %v980_v19 = vpack.c.bf16 %v856_v60, %v855_v48  ;;  %v1154_v60 = vld [vmem:[%s2370_s6 + $0x30] sm:$0xff] }
 0x1e1   :  { %1293 = vmatmul.msk.bf16.vlgmr.msrb.gmra.mxu2 %vm1292_vm11, %v1330_v50  ;;  %1174 = vmatpush.msra.mxu1 %v1157_v47 }
 0x1e2   :  { %1030 = vmatpush.bf16.msrb.mxu3 %v2143_v57  ;;  %v978_v57 = vpack.c.bf16 %v852_v42, %v851_v15  ;;  %v1149_v15 = vld [vmem:[%s2370_s6 + $0x8] sm:$0xff]  ;;  %v1148_v42 = vld [vmem:[%s2370_s6] sm:$0xff] }
 0x1e3   :  { %1175 = vmatpush.msra.mxu1 %v1156_v51 }
 0x1e5   :  { %1283 = vmatmul.msk.bf16.vlgmr.msrb.gmra.mxu3 %vm1282_vm14, %v1330_v50  ;;  %1176 = vmatpush.msra.mxu1 %v1155_v22 }
 0x1e6   :  { %1062 = vmatpush.bf16.msra.mxu3 %v980_v19  ;;  %v1151_v19 = vld [vmem:[%s2370_s6 + $0x18] sm:$0xff] }
 0x1e7   :  { %1177 = vmatpush.msra.mxu1 %v1154_v60 }
 0x1e9   :  { %1178 = vmatpush.msra.mxu1 %v1153_v33 }
 0x1ea   :  { %1063 = vmatpush.bf16.msra.mxu3 %v979_v23  ;;  %v1301_v23 = vld [vmem:[%s2369_s5] ss:$0 sm:$0xff] }
 0x1eb   :  { %1179 = vmatpush.msra.mxu1 %v1152_v1 }
 0x1ed   :  { %1180 = vmatpush.msra.mxu1 %v1151_v19 }
 0x1ee   :  { %1064 = vmatpush.bf16.msra.mxu3 %v978_v57 }
 0x1ef   :  { %1181 = vmatpush.msra.mxu1 %v1150_v35 }
 0x1f1   :  { %1182 = vmatpush.msra.mxu1 %v1149_v15 }
 0x1f2   :  { %1065 = vmatpush.bf16.msra.mxu3 %v977_v17 }
 0x1f3   :  { %1183 = vmatpush.msra.mxu1 %v1148_v42 }
 0x1f6   :  { %1066 = vmatpush.bf16.msra.mxu3 %v2115_v52  ;;  %v1122_v52 = vld [vmem:[%s2368_s4 + $0x78] sm:$0xff] }
 0x1fa   :  { %1067 = vmatpush.bf16.msra.mxu3 %v2104_v43 }
 0x1fe   :  { %1068 = vmatpush.bf16.msra.mxu3 %v2090_v26 }
 0x202   :  { %1069 = vmatpush.bf16.msra.mxu3 %v2067_v61  ;;  %v1118_v61 = vld [vmem:[%s2368_s4 + $0x58] sm:$0xff] }
 0x205   :  { %1289 = vmatmul.msk.bf16.vlgmr.msra.gmra.mxu3 %vm1288_vm1, %v1330_v50  ;;  %v1119_v50 = vld [vmem:[%s2368_s4 + $0x60] sm:$0xff] }
 0x206   :  { %1127 = vmatpush.msrb.mxu3 %v1122_v52 }
 0x208   :  { %1128 = vmatpush.msrb.mxu3 %v1121_v55 }
 0x20a   :  { %1129 = vmatpush.msrb.mxu3 %v1120_v58 }
 0x20c   :  { %1130 = vmatpush.msrb.mxu3 %v1119_v50 }
 0x20e   :  { %1131 = vmatpush.msrb.mxu3 %v1118_v61 }
 0x210   :  { %1132 = vmatpush.msrb.mxu3 %v1117_v45 }
 0x212   :  { %1133 = vmatpush.msrb.mxu3 %v1116_v11 }
 0x214   :  { %1134 = vmatpush.msrb.mxu3 %v1115_v0 }
 0x216   :  { %1135 = vmatpush.msrb.mxu3 %v1114_v8 }
 0x218   :  { %1136 = vmatpush.msrb.mxu3 %v1113_v7 }
 0x21a   :  { %1137 = vmatpush.msrb.mxu3 %v1112_v24 }
 0x21c   :  { %1138 = vmatpush.msrb.mxu3 %v1111_v49 }
 0x21e   :  { %1139 = vmatpush.msrb.mxu3 %v1110_v30 }
 0x220   :  { %1140 = vmatpush.msrb.mxu3 %v1109_v13 }
 0x222   :  { %1141 = vmatpush.msrb.mxu3 %v1108_v3 }
 0x224   :  { %v1019_v34 = vpop.f32.mrf.mxu2  ;;  %1142 = vmatpush.msrb.mxu3 %v1107_v31 }
 0x225   :  { %v1020_v41 = vadd.f32 %v1019_v34, %v1006_v27 }
 0x22c   :  { %v1021_v63 = vpop.f32.mrf.mxu2 }
 0x23b   :  { %v1045_v16 = vpop.f32.mrf.mxu1 }
 0x243   :  { %v1047_v26 = vpop.f32.mrf.mxu1 }
 0x244   :  { %v1058_v43 = vpop.f32.mrf.mxu2 }
 0x24b   :  { %v1084_v14 = vpop.f32.mrf.mxu1 }
 0x24c   :  { %v1060_v62 = vpop.f32.mrf.mxu2 }
 0x253   :  { %v1086_v38 = vpop.f32.mrf.mxu1 }
 0x264   :  { %v1097_v46 = vpop.f32.mrf.mxu2 }
 0x268   :  { %v1032_v59 = vpop.f32.mrf.mxu3 }
 0x269   :  { %v1033_v12 = vadd.f32 %v1032_v59, %v1020_v41 }
 0x26b   :  { %v1046_v44 = vadd.f32 %v1045_v16, %v1033_v12 }
 0x26c   :  { %v1099_v29 = vpop.f32.mrf.mxu2 }
 0x26d   :  { %v1059_v28 = vadd.f32 %v1058_v43, %v1046_v44 }
 0x270   :  { %v1034_v39 = vpop.f32.mrf.mxu3 }
 0x288   :  { %v1071_v18 = vpop.f32.mrf.mxu3 }
 0x289   :  { %v1072_v48 = vadd.f32 %v1071_v18, %v1059_v28 }
 0x28b   :  { %v1085_v9 = vadd.f32 %v1084_v14, %v1072_v48 }
 0x28d   :  { %v1098_v5 = vadd.f32 %v1097_v46, %v1085_v9 }
 0x28f   :  { %v1101_v25 = vadd.f32 %v1098_v5, %v932_v40 }
 0x290   :  { %v1073_v27 = vpop.f32.mrf.mxu3 }
 0x291   :  { %1102 = vst [vmem:[#allocation2] sm:$0x3] %v1101_v25 }
 0x298   :  { %v1106_v4 = vld [vmem:[#allocation2] sm:$0x3] }
 0x299   :  { %1143 = vmatmul.f32.vlgmr.msrb.gmra.mxu3 %v1106_v4 }
 0x31c   :  { %v1144_v36 = vpop.f32.mrf.mxu3 }
 0x31d   :  { %v1145_v56 = vadd.f32 %v1301_v23, %v1144_v36 }
 0x31f   :  { %v1147_v57 = vmax.f32 %v1145_v56, 0.0 }
 0x321   :  { %1184 = vmatmul.f32.vlgmr.msra.gmra.mxu1 %v1147_v57 }
 0x39e   :  { %v1185_v17 = vpop.f32.mrf.mxu1 }
 0x39f   :  { %v1186_v53 = vadd.f32 %v1302_v20, %v1185_v17 }
 0x3a1   :  { %1189 = vst.msk [vmem:[#allocation3] sm:$0x3] %vm36_vm2, %v1186_v53 }
 0x3a2   :  { %1200 = dma.vmem_to_hbm [thread:$0]  %s1196_s27, 32, %s1198_s28, [#allocation4]  }
 0x3a3   :  { %1328 = dma.done.wait [#allocation4], 32  }
 0x3a4   :  { %1329 = vsyncadd [#allocation4], 4294967264 }
 0x3a5   :  { %1205 = vsyncpa [#allocation4], 1 }

</bundles_post_ra>
